<compile_context>
chip_gen: v7x
topology: tpu7x:2x2x1
jax: 0.10.0
libtpu: 0.0.40
codegen_flags: <defaults>
</compile_context>

<pallas_src>
import functools

import jax
import jax.numpy as jnp
from jax import lax
from jax.experimental import pallas as pl
from jax.experimental.pallas import tpu as pltpu


def _round_up(v, m):
    return (v + m - 1) // m * m


def _fused_gnn_kernel(a_ref, x_ref,
                      w1_ref, b1_ref,
                      w2_ref, b2_ref,
                      w3_ref, b3_ref,
                      o_ref, *, hp):
    """All three SAGEConv layers in one kernel; everything resident in VMEM.

    Per layer:
        z   = x @ [W_l | W_r]                      (one wide bf16 MXU matmul, f32 acc)
        out = A_mean @ z[:, :H]  +  z[:, H:]  +  b (aggregation reassociated)
        optional L2-normalize (rsqrt) and leaky_relu(0.1)
    """
    a = a_ref[...]                                        # bf16 [NP, NP]

    def layer(x_bf16, w_ref, b_ref, normalize, leaky):
        z = jnp.dot(x_bf16, w_ref[...],
                    preferred_element_type=jnp.float32)   # [NP, 2*HP] f32
        zl = z[:, :hp]                                    # lin_l(x), to be aggregated
        zr = z[:, hp:]                                    # lin_r(x), root term
        out = (jnp.dot(a, zl.astype(jnp.bfloat16),
                       preferred_element_type=jnp.float32)
               + zr + b_ref[...])                         # [NP, HP] f32
        if normalize:                                     # F.normalize(out, dim=-1)
            ss = jnp.sum(out * out, axis=-1, keepdims=True)
            out = out * lax.rsqrt(jnp.maximum(ss, 1e-24))
        if leaky:                                         # leaky_relu, slope 0.1
            out = jnp.where(out >= 0.0, out, 0.1 * out)
        return out

    h1 = layer(x_ref[...], w1_ref, b1_ref, normalize=True, leaky=True)
    h2 = layer(h1.astype(jnp.bfloat16), w2_ref, b2_ref, normalize=True, leaky=True)
    h3 = layer(h2.astype(jnp.bfloat16), w3_ref, b3_ref, normalize=False, leaky=False)
    o_ref[...] = h3.astype(o_ref.dtype)


def build_mean_adjacency(edge_index, num_nodes):
    """edge_index: [2, E] int32 (row 0 = src, row 1 = dst) -> [N, N] f32 mean-agg matrix."""
    src, dst = edge_index[0], edge_index[1]
    a = jnp.zeros((num_nodes, num_nodes), jnp.float32).at[dst, src].add(1.0)
    deg = jnp.sum(a, axis=1, keepdims=True)
    return jnp.where(deg > 0, a / jnp.maximum(deg, 1.0), 0.0)


def glorot(key, fan_in, fan_out):
    lim = jnp.sqrt(6.0 / (fan_in + fan_out))
    return jax.random.uniform(key, (fan_in, fan_out), jnp.float32, -lim, lim)


def init_gnn_params(key, in_channels, hidden_channels):
    dims = [(in_channels, hidden_channels),
            (hidden_channels, hidden_channels),
            (hidden_channels, hidden_channels)]
    params = []
    for (fi, fo) in dims:
        key, k1, k2 = jax.random.split(key, 3)
        params.append({
            "w_l": glorot(k1, fi, fo),   # lin_l: applied to aggregated neighbors (has bias)
            "w_r": glorot(k2, fi, fo),   # lin_r: applied to root features (no bias)
            "b": jnp.zeros((fo,), jnp.float32),
        })
    return params


def gnn_forward(x, edge_index, params):
    n, f = x.shape
    h = params[0]["w_l"].shape[1]

    # Pad everything to lane-dense (multiples of 128) shapes on the host.
    np_ = _round_up(n, 128)
    fp = _round_up(f, 128)
    hp = _round_up(h, 128)

    a = build_mean_adjacency(edge_index, n)
    a_pad = jnp.zeros((np_, np_), jnp.float32).at[:n, :n].set(a).astype(jnp.bfloat16)
    x_pad = jnp.zeros((np_, fp), jnp.float32).at[:n, :f].set(x).astype(jnp.bfloat16)

    def pack(p):
        fi = p["w_l"].shape[0]
        f_in = _round_up(fi, 128)
        w = jnp.zeros((f_in, 2 * hp), jnp.float32)
        w = w.at[:fi, :h].set(p["w_l"]).at[:fi, hp:hp + h].set(p["w_r"])
        b = jnp.zeros((1, hp), jnp.float32).at[0, :h].set(p["b"])
        return w.astype(jnp.bfloat16), b

    w1, b1 = pack(params[0])
    w2, b2 = pack(params[1])
    w3, b3 = pack(params[2])

    # VMEM budget: double-buffered I/O plus f32 intermediates; cap at 32 MiB
    # (safe scoped limit on v5e/v6e/v7x).
    bytes_in = (a_pad.size + x_pad.size + w1.size + w2.size + w3.size) * 2 \
               + (b1.size + b2.size + b3.size) * 4
    bytes_out = np_ * hp * 4
    needed = 2 * (bytes_in + bytes_out) + 8 * np_ * hp * 4
    if needed > 32 * 1024 * 1024:
        # TODO(synk): switch to CSR gather + row-tiled pipeline for large graphs.
        raise NotImplementedError("graph too large for the fused resident-A kernel")
    vmem_bytes = min(32 * 1024 * 1024, max(4 * 1024 * 1024, needed))

    kern = functools.partial(_fused_gnn_kernel, hp=hp)
    out = pl.pallas_call(
        kern,
        out_shape=jax.ShapeDtypeStruct((np_, hp), jnp.float32),
        grid=(1,),
        in_specs=[
            pl.BlockSpec((np_, np_), lambda i: (0, 0)),       # A_mean (bf16)
            pl.BlockSpec((np_, fp), lambda i: (0, 0)),        # x (bf16)
            pl.BlockSpec((fp, 2 * hp), lambda i: (0, 0)),     # [W1_l | W1_r]
            pl.BlockSpec((1, hp), lambda i: (0, 0)),          # b1
            pl.BlockSpec((hp, 2 * hp), lambda i: (0, 0)),     # [W2_l | W2_r]
            pl.BlockSpec((1, hp), lambda i: (0, 0)),          # b2
            pl.BlockSpec((hp, 2 * hp), lambda i: (0, 0)),     # [W3_l | W3_r]
            pl.BlockSpec((1, hp), lambda i: (0, 0)),          # b3
        ],
        out_specs=pl.BlockSpec((np_, hp), lambda i: (0, 0)),
        compiler_params=pltpu.CompilerParams(
            dimension_semantics=("arbitrary",),
            vmem_limit_bytes=vmem_bytes,
        ),
    )(a_pad, x_pad, w1, b1, w2, b2, w3, b3)

    return out[:n, :h]


if __name__ == "__main__":
    key = jax.random.PRNGKey(0)
    num_nodes, in_channels, hidden_channels = 16, 8, 32

    k_x, k_e, k_p = jax.random.split(key, 3)
    x = jax.random.normal(k_x, (num_nodes, in_channels), jnp.float32)

    # deterministic small graph: a ring plus a handful of random edges
    ring_src = jnp.arange(num_nodes, dtype=jnp.int32)
    ring_dst = (ring_src + 1) % num_nodes
    extra_src = jax.random.randint(k_e, (8,), 0, num_nodes, jnp.int32)
    extra_dst = jax.random.randint(jax.random.fold_in(k_e, 1), (8,), 0, num_nodes, jnp.int32)
    edge_index = jnp.stack([jnp.concatenate([ring_src, extra_src]),
                            jnp.concatenate([ring_dst, extra_dst])], axis=0)

    params = init_gnn_params(k_p, in_channels, hidden_channels)

    out = gnn_forward(x, edge_index, params)
    out = jax.block_until_ready(out)
    assert out.shape == (num_nodes, hidden_channels)
    assert bool(jnp.all(jnp.isfinite(out)))
    print("KERNEL_OK")
</pallas_src>

<mosaic_0001>
module attributes {stable_mosaic.version = 11 : i64} {
  func.func @_fused_gnn_kernel(%arg0: i32, %arg1: memref<128x128xbf16, #tpu.memory_space<vmem>>, %arg2: memref<128x128xbf16, #tpu.memory_space<vmem>>, %arg3: memref<128x256xbf16, #tpu.memory_space<vmem>>, %arg4: memref<1x128xf32, #tpu.memory_space<vmem>>, %arg5: memref<128x256xbf16, #tpu.memory_space<vmem>>, %arg6: memref<1x128xf32, #tpu.memory_space<vmem>>, %arg7: memref<128x256xbf16, #tpu.memory_space<vmem>>, %arg8: memref<1x128xf32, #tpu.memory_space<vmem>>, %arg9: memref<128x128xf32, #tpu.memory_space<vmem>>) attributes {dimension_semantics = [#tpu.dimension_semantics<arbitrary>], iteration_bounds = array<i64: 1>, scalar_prefetch = 0 : i64, scratch_operands = 0 : i64, tpu.core_type = #tpu.core_type<tc>, window_params = [{pipeline_mode = #tpu.pipeline_mode<synchronous>, transform_indices = @transform_0, window_bounds = array<i64: 128, 128>}, {pipeline_mode = #tpu.pipeline_mode<synchronous>, transform_indices = @transform_1, window_bounds = array<i64: 128, 128>}, {pipeline_mode = #tpu.pipeline_mode<synchronous>, transform_indices = @transform_2, window_bounds = array<i64: 128, 256>}, {pipeline_mode = #tpu.pipeline_mode<synchronous>, transform_indices = @transform_3, window_bounds = array<i64: 1, 128>}, {pipeline_mode = #tpu.pipeline_mode<synchronous>, transform_indices = @transform_4, window_bounds = array<i64: 128, 256>}, {pipeline_mode = #tpu.pipeline_mode<synchronous>, transform_indices = @transform_5, window_bounds = array<i64: 1, 128>}, {pipeline_mode = #tpu.pipeline_mode<synchronous>, transform_indices = @transform_6, window_bounds = array<i64: 128, 256>}, {pipeline_mode = #tpu.pipeline_mode<synchronous>, transform_indices = @transform_7, window_bounds = array<i64: 1, 128>}, {pipeline_mode = #tpu.pipeline_mode<synchronous>, transform_indices = @transform_8, window_bounds = array<i64: 128, 128>}]} {
    %c0 = arith.constant 0 : index
    %c0_0 = arith.constant 0 : index
    %0 = vector.load %arg1[%c0, %c0_0] : memref<128x128xbf16, #tpu.memory_space<vmem>>, vector<128x128xbf16>
    %c0_1 = arith.constant 0 : index
    %c0_2 = arith.constant 0 : index
    %1 = vector.load %arg2[%c0_1, %c0_2] : memref<128x128xbf16, #tpu.memory_space<vmem>>, vector<128x128xbf16>
    %c0_3 = arith.constant 0 : index
    %c0_4 = arith.constant 0 : index
    %2 = vector.load %arg3[%c0_3, %c0_4] : memref<128x256xbf16, #tpu.memory_space<vmem>>, vector<128x256xbf16>
    %cst = arith.constant dense<0.000000e+00> : vector<128x256xf32>
    %3 = tpu.matmul %1, %2, %cst {dimension_numbers = #tpu.dot_dimension_numbers<[1], [0], [0], [1], [0, 0, 1, 1], [], []>} : vector<128x128xbf16>, vector<128x256xbf16>, vector<128x256xf32> -> vector<128x256xf32>
    %4 = vector.extract_strided_slice %3 {offsets = [0, 0], sizes = [128, 128], strides = [1, 1]} : vector<128x256xf32> to vector<128x128xf32>
    %5 = vector.extract_strided_slice %3 {offsets = [0, 128], sizes = [128, 128], strides = [1, 1]} : vector<128x256xf32> to vector<128x128xf32>
    %6 = arith.truncf %4 : vector<128x128xf32> to vector<128x128xbf16>
    %cst_5 = arith.constant dense<0.000000e+00> : vector<128x128xf32>
    %7 = tpu.matmul %0, %6, %cst_5 {dimension_numbers = #tpu.dot_dimension_numbers<[1], [0], [0], [1], [0, 0, 1, 1], [], []>} : vector<128x128xbf16>, vector<128x128xbf16>, vector<128x128xf32> -> vector<128x128xf32>
    %8 = arith.addf %7, %5 : vector<128x128xf32>
    %c0_6 = arith.constant 0 : index
    %c0_7 = arith.constant 0 : index
    %9 = vector.load %arg4[%c0_6, %c0_7] : memref<1x128xf32, #tpu.memory_space<vmem>>, vector<1x128xf32>
    %10 = vector.broadcast %9 : vector<1x128xf32> to vector<128x128xf32>
    %11 = arith.addf %8, %10 : vector<128x128xf32>
    %12 = arith.mulf %11, %11 : vector<128x128xf32>
    %cst_8 = arith.constant dense<0.000000e+00> : vector<128xf32>
    %13 = vector.multi_reduction <add>, %12, %cst_8 [1] : vector<128x128xf32> to vector<128xf32>
    %14 = vector.shape_cast %13 : vector<128xf32> to vector<128x1xf32>
    %cst_9 = arith.constant 1.000000e-24 : f32
    %15 = vector.broadcast %cst_9 : f32 to vector<128x1xf32>
    %16 = arith.maximumf %14, %15 : vector<128x1xf32>
    %17 = math.rsqrt %16 : vector<128x1xf32>
    %18 = vector.broadcast %17 : vector<128x1xf32> to vector<128x128xf32>
    %19 = arith.mulf %11, %18 : vector<128x128xf32>
    %cst_10 = arith.constant 0.000000e+00 : f32
    %20 = vector.broadcast %cst_10 : f32 to vector<128x128xf32>
    %21 = arith.cmpf oge, %19, %20 : vector<128x128xf32>
    %cst_11 = arith.constant 1.000000e-01 : f32
    %22 = vector.broadcast %cst_11 : f32 to vector<128x128xf32>
    %23 = arith.mulf %22, %19 : vector<128x128xf32>
    %24 = arith.select %21, %19, %23 : vector<128x128xi1>, vector<128x128xf32>
    %25 = arith.truncf %24 : vector<128x128xf32> to vector<128x128xbf16>
    %c0_12 = arith.constant 0 : index
    %c0_13 = arith.constant 0 : index
    %26 = vector.load %arg5[%c0_12, %c0_13] : memref<128x256xbf16, #tpu.memory_space<vmem>>, vector<128x256xbf16>
    %cst_14 = arith.constant dense<0.000000e+00> : vector<128x256xf32>
    %27 = tpu.matmul %25, %26, %cst_14 {dimension_numbers = #tpu.dot_dimension_numbers<[1], [0], [0], [1], [0, 0, 1, 1], [], []>} : vector<128x128xbf16>, vector<128x256xbf16>, vector<128x256xf32> -> vector<128x256xf32>
    %28 = vector.extract_strided_slice %27 {offsets = [0, 0], sizes = [128, 128], strides = [1, 1]} : vector<128x256xf32> to vector<128x128xf32>
    %29 = vector.extract_strided_slice %27 {offsets = [0, 128], sizes = [128, 128], strides = [1, 1]} : vector<128x256xf32> to vector<128x128xf32>
    %30 = arith.truncf %28 : vector<128x128xf32> to vector<128x128xbf16>
    %cst_15 = arith.constant dense<0.000000e+00> : vector<128x128xf32>
    %31 = tpu.matmul %0, %30, %cst_15 {dimension_numbers = #tpu.dot_dimension_numbers<[1], [0], [0], [1], [0, 0, 1, 1], [], []>} : vector<128x128xbf16>, vector<128x128xbf16>, vector<128x128xf32> -> vector<128x128xf32>
    %32 = arith.addf %31, %29 : vector<128x128xf32>
    %c0_16 = arith.constant 0 : index
    %c0_17 = arith.constant 0 : index
    %33 = vector.load %arg6[%c0_16, %c0_17] : memref<1x128xf32, #tpu.memory_space<vmem>>, vector<1x128xf32>
    %34 = vector.broadcast %33 : vector<1x128xf32> to vector<128x128xf32>
    %35 = arith.addf %32, %34 : vector<128x128xf32>
    %36 = arith.mulf %35, %35 : vector<128x128xf32>
    %cst_18 = arith.constant dense<0.000000e+00> : vector<128xf32>
    %37 = vector.multi_reduction <add>, %36, %cst_18 [1] : vector<128x128xf32> to vector<128xf32>
    %38 = vector.shape_cast %37 : vector<128xf32> to vector<128x1xf32>
    %cst_19 = arith.constant 1.000000e-24 : f32
    %39 = vector.broadcast %cst_19 : f32 to vector<128x1xf32>
    %40 = arith.maximumf %38, %39 : vector<128x1xf32>
    %41 = math.rsqrt %40 : vector<128x1xf32>
    %42 = vector.broadcast %41 : vector<128x1xf32> to vector<128x128xf32>
    %43 = arith.mulf %35, %42 : vector<128x128xf32>
    %cst_20 = arith.constant 0.000000e+00 : f32
    %44 = vector.broadcast %cst_20 : f32 to vector<128x128xf32>
    %45 = arith.cmpf oge, %43, %44 : vector<128x128xf32>
    %cst_21 = arith.constant 1.000000e-01 : f32
    %46 = vector.broadcast %cst_21 : f32 to vector<128x128xf32>
    %47 = arith.mulf %46, %43 : vector<128x128xf32>
    %48 = arith.select %45, %43, %47 : vector<128x128xi1>, vector<128x128xf32>
    %49 = arith.truncf %48 : vector<128x128xf32> to vector<128x128xbf16>
    %c0_22 = arith.constant 0 : index
    %c0_23 = arith.constant 0 : index
    %50 = vector.load %arg7[%c0_22, %c0_23] : memref<128x256xbf16, #tpu.memory_space<vmem>>, vector<128x256xbf16>
    %cst_24 = arith.constant dense<0.000000e+00> : vector<128x256xf32>
    %51 = tpu.matmul %49, %50, %cst_24 {dimension_numbers = #tpu.dot_dimension_numbers<[1], [0], [0], [1], [0, 0, 1, 1], [], []>} : vector<128x128xbf16>, vector<128x256xbf16>, vector<128x256xf32> -> vector<128x256xf32>
    %52 = vector.extract_strided_slice %51 {offsets = [0, 0], sizes = [128, 128], strides = [1, 1]} : vector<128x256xf32> to vector<128x128xf32>
    %53 = vector.extract_strided_slice %51 {offsets = [0, 128], sizes = [128, 128], strides = [1, 1]} : vector<128x256xf32> to vector<128x128xf32>
    %54 = arith.truncf %52 : vector<128x128xf32> to vector<128x128xbf16>
    %cst_25 = arith.constant dense<0.000000e+00> : vector<128x128xf32>
    %55 = tpu.matmul %0, %54, %cst_25 {dimension_numbers = #tpu.dot_dimension_numbers<[1], [0], [0], [1], [0, 0, 1, 1], [], []>} : vector<128x128xbf16>, vector<128x128xbf16>, vector<128x128xf32> -> vector<128x128xf32>
    %56 = arith.addf %55, %53 : vector<128x128xf32>
    %c0_26 = arith.constant 0 : index
    %c0_27 = arith.constant 0 : index
    %57 = vector.load %arg8[%c0_26, %c0_27] : memref<1x128xf32, #tpu.memory_space<vmem>>, vector<1x128xf32>
    %58 = vector.broadcast %57 : vector<1x128xf32> to vector<128x128xf32>
    %59 = arith.addf %56, %58 : vector<128x128xf32>
    %c0_28 = arith.constant 0 : index
    %c0_29 = arith.constant 0 : index
    %60 = vector.load %arg9[%c0_28, %c0_29] : memref<128x128xf32, #tpu.memory_space<vmem>>, vector<128x128xf32>
    tpu.vector_store %arg9[%c0_28, %c0_29], %59 {strides = array<i32>} : memref<128x128xf32, #tpu.memory_space<vmem>>, vector<128x128xf32>,
    return
  }
  func.func @transform_0(%arg0: i32) -> (i32, i32) {
    %c0_i32 = arith.constant 0 : i32
    %c0_i32_0 = arith.constant 0 : i32
    %c0_i32_1 = arith.constant 0 : i32
    return %c0_i32, %c0_i32_0 : i32, i32
  }
  func.func @transform_1(%arg0: i32) -> (i32, i32) {
    %c0_i32 = arith.constant 0 : i32
    %c0_i32_0 = arith.constant 0 : i32
    %c0_i32_1 = arith.constant 0 : i32
    return %c0_i32, %c0_i32_0 : i32, i32
  }
  func.func @transform_2(%arg0: i32) -> (i32, i32) {
    %c0_i32 = arith.constant 0 : i32
    %c0_i32_0 = arith.constant 0 : i32
    %c0_i32_1 = arith.constant 0 : i32
    return %c0_i32, %c0_i32_0 : i32, i32
  }
  func.func @transform_3(%arg0: i32) -> (i32, i32) {
    %c0_i32 = arith.constant 0 : i32
    %c0_i32_0 = arith.constant 0 : i32
    %c0_i32_1 = arith.constant 0 : i32
    return %c0_i32, %c0_i32_0 : i32, i32
  }
  func.func @transform_4(%arg0: i32) -> (i32, i32) {
    %c0_i32 = arith.constant 0 : i32
    %c0_i32_0 = arith.constant 0 : i32
    %c0_i32_1 = arith.constant 0 : i32
    return %c0_i32, %c0_i32_0 : i32, i32
  }
  func.func @transform_5(%arg0: i32) -> (i32, i32) {
    %c0_i32 = arith.constant 0 : i32
    %c0_i32_0 = arith.constant 0 : i32
    %c0_i32_1 = arith.constant 0 : i32
    return %c0_i32, %c0_i32_0 : i32, i32
  }
  func.func @transform_6(%arg0: i32) -> (i32, i32) {
    %c0_i32 = arith.constant 0 : i32
    %c0_i32_0 = arith.constant 0 : i32
    %c0_i32_1 = arith.constant 0 : i32
    return %c0_i32, %c0_i32_0 : i32, i32
  }
  func.func @transform_7(%arg0: i32) -> (i32, i32) {
    %c0_i32 = arith.constant 0 : i32
    %c0_i32_0 = arith.constant 0 : i32
    %c0_i32_1 = arith.constant 0 : i32
    return %c0_i32, %c0_i32_0 : i32, i32
  }
  func.func @transform_8(%arg0: i32) -> (i32, i32) {
    %c0_i32 = arith.constant 0 : i32
    %c0_i32_0 = arith.constant 0 : i32
    %c0_i32_1 = arith.constant 0 : i32
    return %c0_i32, %c0_i32_0 : i32, i32
  }
}

</mosaic_0001>

<bundles_post_ra>
// kernel: tpu_custom_call.1
= control target key start
LH: loop header
LB: loop body
LE: loop exit
PB: predicated region body
PF: predicated region fallthrough
CT: control target
= control target key end

     0   :  { %13 = vsyncpa [#allocation3], 0  ;;  %s2668_s0 = inlined_call_operand.hbm [shape: bf16[128,128], index: 0, kind: input, shape index: {}]   ;;  %s2669_s1 = inlined_call_operand.hbm [shape: bf16[128,128], index: 1, kind: input, shape index: {}]   ;;  %s2670_s2 = inlined_call_operand.hbm [shape: bf16[128,256], index: 2, kind: input, shape index: {}]   ;;  %s2671_s3 = inlined_call_operand.vmem [shape: f32[1,128], index: 3, kind: input, shape index: {}]   ;;  %s2672_s4 = inlined_call_operand.hbm [shape: bf16[128,256], index: 4, kind: input, shape index: {}]   ;;  %s2673_s5 = inlined_call_operand.vmem [shape: f32[1,128], index: 5, kind: input, shape index: {}]   ;;  %s2674_s6 = inlined_call_operand.hbm [shape: bf16[128,256], index: 6, kind: input, shape index: {}]   ;;  %s2675_s7 = inlined_call_operand.vmem [shape: f32[1,128], index: 7, kind: input, shape index: {}]   ;;  %s2676_s8 = inlined_call_operand.hbm [shape: f32[128,128], index: 8, kind: output, shape index: {}]  }
   0x1   :  { %14 = vsyncpa [#allocation6], 0 }
   0x2   :  { %15 = vsyncpa [#allocation9], 0 }
   0x3   :  { %16 = vsyncpa [#allocation4], 0  ;;  %s2098_s27 = smov [#allocation5]   ;;  %s1958_s9 = scalar_lea.hbm %s2669_s1, 1024 }
   0x4   :  { %s34_s28 = sshll.u32 %s2098_s27, 4  ;;  %p1959_p0 = scmp.ne.s32.totalorder %s2669_s1, %s1958_s9  ;;  %s35_s28 = int_to_ptr.vmem [resolvable:$true] %s34_s28 }
   0x5   :  { %p1962_p1 = scmp.lt.u32.totalorder %s1958_s9, %s2669_s1 }
   0x7   :  { %p1964_p2 = pnand %p1962_p1, %p1959_p0 }
   0x9   :  { %1967 = shalt.err (!%p1964_p2)
}
   0xa   :  { %s1968_s14 = scalar_lea.vmem %s35_s28, 1024  ;;  %p1973_p4 = scmp.lt.s32.totalorder %s35_s28, %s35_s28 }
   0xb   :  { %p1969_p3 = scmp.ne.s32.totalorder %s35_s28, %s1968_s14  ;;  %p1974_p5 = scmp.lt.s32.totalorder %s1968_s14, %s1968_s14 }
   0xd   :  { %p1975_p6 = por %p1974_p5, %p1973_p4 }
   0xf   :  { %p1976_p7 = pnand %p1975_p6, %p1969_p3 }
  0x11   :  { %1979 = shalt.err (!%p1976_p7)
}
  0x12   :  { %s2099_s15 = smov 64   ;;  %s2100_s16 = smov 4  }
  0x13   :  { %40 = dma.hbm_to_vmem [thread:$0]  %s2669_s1, 1024, %s35_s28, [#allocation6], %s2099_s15, %s2099_s15, %s2100_s16  }
  0x14   :  { %s2101_s19 = smov [#allocation8]   ;;  %s2102_s21 = smov [#allocation2]  }
  0x15   :  { %s60_s20 = sshll.u32 %s2101_s19, 4  ;;  %s22_s22 = sshll.u32 %s2102_s21, 4  ;;  %s61_s20 = int_to_ptr.vmem [resolvable:$true] %s60_s20  ;;  %s23_s22 = int_to_ptr.vmem [resolvable:$true] %s22_s22 }
  0x16   :  { %s1980_s25 = scalar_lea.hbm %s2672_s4, 2048 }
  0x17   :  { %p1981_p8 = scmp.ne.s32.totalorder %s2672_s4, %s1980_s25  ;;  %p1984_p9 = scmp.lt.u32.totalorder %s1980_s25, %s2672_s4 }
  0x19   :  { %p1986_p10 = pnand %p1984_p9, %p1981_p8 }
  0x1b   :  { %1989 = shalt.err (!%p1986_p10)
}
  0x1c   :  { %s1990_s1 = scalar_lea.vmem %s61_s20, 2048  ;;  %p1995_p12 = scmp.lt.s32.totalorder %s61_s20, %s61_s20 }
  0x1d   :  { %p1991_p11 = scmp.ne.s32.totalorder %s61_s20, %s1990_s1  ;;  %p1996_p13 = scmp.lt.s32.totalorder %s1990_s1, %s1990_s1 }
  0x1f   :  { %p1997_p0 = por %p1996_p13, %p1995_p12 }
  0x21   :  { %p1998_p1 = pnand %p1997_p0, %p1991_p11 }
  0x23   :  { %2001 = shalt.err (!%p1998_p1)
}
  0x24   :  { %s2103_s28 = smov 128   ;;  %s2104_s9 = smov 8  }
  0x25   :  { %66 = dma.hbm_to_vmem [thread:$0]  %s2672_s4, 2048, %s61_s20, [#allocation9], %s2103_s28, %s2103_s28, %s2104_s9  }
  0x26   :  { %s2002_s14 = scalar_lea.hbm %s2668_s0, 1024 }
  0x27   :  { %p2003_p2 = scmp.ne.s32.totalorder %s2668_s0, %s2002_s14  ;;  %p2006_p3 = scmp.lt.u32.totalorder %s2002_s14, %s2668_s0 }
  0x29   :  { %p2008_p4 = pnand %p2006_p3, %p2003_p2 }
  0x2b   :  { %2011 = shalt.err (!%p2008_p4)
}
  0x2c   :  { %s2012_s23 = scalar_lea.vmem %s23_s22, 1024  ;;  %p2017_p6 = scmp.lt.s32.totalorder %s23_s22, %s23_s22 }
  0x2d   :  { %p2013_p5 = scmp.ne.s32.totalorder %s23_s22, %s2012_s23  ;;  %p2018_p7 = scmp.lt.s32.totalorder %s2012_s23, %s2012_s23 }
  0x2f   :  { %p2019_p8 = por %p2018_p7, %p2017_p6 }
  0x31   :  { %p2020_p9 = pnand %p2019_p8, %p2013_p5 }
  0x33   :  { %2023 = shalt.err (!%p2020_p9)
}
  0x34   :  { %28 = dma.hbm_to_vmem [thread:$0]  %s2668_s0, 1024, %s23_s22, [#allocation3], %s2099_s15, %s2099_s15, %s2100_s16  }
  0x35   :  { %s2105_s24 = smov [#allocation7]   ;;  %s2106_s26 = smov [#allocation10]  }
  0x36   :  { %s46_s25 = sshll.u32 %s2105_s24, 4  ;;  %s74_s27 = sshll.u32 %s2106_s26, 4  ;;  %s47_s25 = int_to_ptr.vmem [resolvable:$true] %s46_s25  ;;  %s75_s27 = int_to_ptr.vmem [resolvable:$true] %s74_s27 }
  0x37   :  { %s2024_s1 = scalar_lea.hbm %s2670_s2, 2048 }
  0x38   :  { %p2025_p10 = scmp.ne.s32.totalorder %s2670_s2, %s2024_s1  ;;  %p2028_p11 = scmp.lt.u32.totalorder %s2024_s1, %s2670_s2 }
  0x3a   :  { %p2030_p12 = pnand %p2028_p11, %p2025_p10 }
  0x3c   :  { %2033 = shalt.err (!%p2030_p12)
}
  0x3d   :  { %s2034_s0 = scalar_lea.vmem %s47_s25, 2048  ;;  %p2039_p0 = scmp.lt.s32.totalorder %s47_s25, %s47_s25 }
  0x3e   :  { %p2035_p13 = scmp.ne.s32.totalorder %s47_s25, %s2034_s0  ;;  %p2040_p1 = scmp.lt.s32.totalorder %s2034_s0, %s2034_s0 }
  0x40   :  { %p2041_p2 = por %p2040_p1, %p2039_p0 }
  0x42   :  { %p2042_p3 = pnand %p2041_p2, %p2035_p13 }
  0x44   :  { %2045 = shalt.err (!%p2042_p3)
}
  0x45   :  { %52 = dma.hbm_to_vmem [thread:$0]  %s2670_s2, 2048, %s47_s25, [#allocation6], %s2103_s28, %s2103_s28, %s2104_s9  }
  0x46   :  { %s2046_s17 = scalar_lea.hbm %s2674_s6, 2048 }
  0x47   :  { %p2047_p4 = scmp.ne.s32.totalorder %s2674_s6, %s2046_s17  ;;  %p2050_p5 = scmp.lt.u32.totalorder %s2046_s17, %s2674_s6 }
  0x49   :  { %p2052_p6 = pnand %p2050_p5, %p2047_p4 }
  0x4b   :  { %2055 = shalt.err (!%p2052_p6)
}
  0x4c   :  { %s2056_s4 = scalar_lea.vmem %s75_s27, 2048  ;;  %p2061_p8 = scmp.lt.s32.totalorder %s75_s27, %s75_s27 }
  0x4d   :  { %p2057_p7 = scmp.ne.s32.totalorder %s75_s27, %s2056_s4  ;;  %p2062_p9 = scmp.lt.s32.totalorder %s2056_s4, %s2056_s4 }
  0x4f   :  { %p2063_p10 = por %p2062_p9, %p2061_p8 }
  0x51   :  { %p2064_p11 = pnand %p2063_p10, %p2057_p7 }
  0x53   :  { %2067 = shalt.err (!%p2064_p11)
}
  0x54   :  { %80 = dma.hbm_to_vmem [thread:$0]  %s2674_s6, 2048, %s75_s27, [#allocation9], %s2103_s28, %s2103_s28, %s2104_s9  }
  0x55   :  { %2090 = dma.done.wait [#allocation3], 1024  }
  0x56   :  { %2091 = vsyncadd [#allocation3], 4294966272 }
  0x57   :  { %2092 = dma.done.wait [#allocation6], 3072  }
  0x58   :  { %2093 = vsyncadd [#allocation6], 4294964224 }
  0x59   :  { %2094 = dma.done.wait [#allocation9], 4096  }
  0x5a   :  { %2095 = vsyncadd [#allocation9], 4294963200  ;;  %v2107_v0 = vmov 0   ;;  %v1799_v1 = vld [vmem:[#allocation7 + $0x4] ss:$8 sps:$4 sm:$0xff]   ;;  %v1825_v19 = vld [vmem:[#allocation5 + $0x10] sm:$0xff]  }
  0x5b   :  { %307 = vmatprep.mubr.bf16.mxu0 %v2107_v0  ;;  %v1801_v2 = vld [vmem:[#allocation7] ss:$8 sps:$4 sm:$0xff]   ;;  %275 = vmatprep.subr.bf16.mxu0 %v1799_v1  ;;  %v1802_v3 = vld [vmem:[#allocation7 + $0x14] ss:$8 sps:$4 sm:$0xff]   ;;  %v1804_v4 = vld [vmem:[#allocation7 + $0x10] ss:$8 sps:$4 sm:$0xff]  }
  0x5c   :  { %276 = vmatpush1.bf16.msra.mxu0 %v1801_v2  ;;  %v1805_v5 = vld [vmem:[#allocation7 + $0x24] ss:$8 sps:$4 sm:$0xff]   ;;  %v1807_v6 = vld [vmem:[#allocation7 + $0x20] ss:$8 sps:$4 sm:$0xff]   ;;  %v1808_v7 = vld [vmem:[#allocation7 + $0x34] ss:$8 sps:$4 sm:$0xff]  }
  0x5d   :  { %277 = vmatprep.subr.bf16.mxu0 %v1802_v3  ;;  %v1810_v8 = vld [vmem:[#allocation7 + $0x30] ss:$8 sps:$4 sm:$0xff]   ;;  %v1811_v9 = vld [vmem:[#allocation7 + $0x44] ss:$8 sps:$4 sm:$0xff]   ;;  %v1813_v10 = vld [vmem:[#allocation7 + $0x40] ss:$8 sps:$4 sm:$0xff]  }
  0x5e   :  { %v1814_v11 = vld [vmem:[#allocation7 + $0x54] ss:$8 sps:$4 sm:$0xff]   ;;  %v1816_v12 = vld [vmem:[#allocation7 + $0x50] ss:$8 sps:$4 sm:$0xff]   ;;  %v1817_v13 = vld [vmem:[#allocation7 + $0x64] ss:$8 sps:$4 sm:$0xff]  }
  0x5f   :  { %v1819_v14 = vld [vmem:[#allocation7 + $0x60] ss:$8 sps:$4 sm:$0xff]   ;;  %v1820_v15 = vld [vmem:[#allocation7 + $0x74] ss:$8 sps:$4 sm:$0xff]   ;;  %v1822_v16 = vld [vmem:[#allocation7 + $0x70] ss:$8 sps:$4 sm:$0xff]  }
  0x60   :  { %278 = vmatpush1.bf16.msra.mxu0 %v1804_v4  ;;  %v1823_v17 = vld [vmem:[#allocation5] sm:$0xff]   ;;  %v1824_v18 = vld [vmem:[#allocation5 + $0x8] sm:$0xff]   ;;  %v1826_v20 = vld [vmem:[#allocation5 + $0x18] sm:$0xff]  }
  0x61   :  { %279 = vmatprep.subr.bf16.mxu0 %v1805_v5  ;;  %v1827_v21 = vld [vmem:[#allocation5 + $0x20] sm:$0xff]   ;;  %v1828_v22 = vld [vmem:[#allocation5 + $0x28] sm:$0xff]   ;;  %v1829_v23 = vld [vmem:[#allocation5 + $0x30] sm:$0xff]  }
  0x62   :  { %v1830_v24 = vld [vmem:[#allocation5 + $0x38] sm:$0xff]   ;;  %v2237_v25 = vld [vmem:[#allocation2] sm:$0xff]   ;;  %v2273_v3 = vld [vmem:[#allocation2 + $0x8] sm:$0xff]  }
  0x63   :  { %1708 = vmatprep.mubr.bf16.mxu1 %v2237_v25  ;;  %v2275_v4 = vld [vmem:[#allocation2 + $0x10] sm:$0xff]   ;;  %v2279_v5 = vld [vmem:[#allocation2 + $0x18] sm:$0xff]  }
  0x64   :  { %280 = vmatpush1.bf16.msra.mxu0 %v1807_v6  ;;  %v2281_v6 = vld [vmem:[#allocation2 + $0x20] sm:$0xff]  }
  0x65   :  { %281 = vmatprep.subr.bf16.mxu0 %v1808_v7  ;;  %v2285_v7 = vld [vmem:[#allocation2 + $0x28] sm:$0xff]  }
  0x68   :  { %282 = vmatpush1.bf16.msra.mxu0 %v1810_v8  ;;  %v2287_v8 = vld [vmem:[#allocation2 + $0x30] sm:$0xff]  }
  0x69   :  { %283 = vmatprep.subr.bf16.mxu0 %v1811_v9  ;;  %v2291_v9 = vld [vmem:[#allocation2 + $0x38] sm:$0xff]  }
  0x6c   :  { %284 = vmatpush1.bf16.msra.mxu0 %v1813_v10  ;;  %v1839_v10 = vld [vmem:[#allocation8] ss:$8 sps:$4 sm:$0xff]  }
  0x6d   :  { %285 = vmatprep.subr.bf16.mxu0 %v1814_v11  ;;  %v1841_v11 = vld [vmem:[#allocation8 + $0x4] ss:$8 sps:$4 sm:$0xff]  }
  0x70   :  { %286 = vmatpush1.bf16.msra.mxu0 %v1816_v12  ;;  %v1844_v12 = vld [vmem:[#allocation8 + $0x14] ss:$8 sps:$4 sm:$0xff]  }
  0x71   :  { %287 = vmatprep.subr.bf16.mxu0 %v1817_v13  ;;  %v1842_v13 = vld [vmem:[#allocation8 + $0x10] ss:$8 sps:$4 sm:$0xff]  }
  0x74   :  { %288 = vmatpush1.bf16.msra.mxu0 %v1819_v14 }
  0x75   :  { %289 = vmatprep.subr.bf16.mxu0 %v1820_v15  ;;  %v2298_v15 = vld [vmem:[%s2671_s3] ss:$0 sm:$0xff] }
  0x78   :  { %290 = vmatpush1.bf16.msra.mxu0 %v1822_v16 }
  0x7b   :  { %308 = vmatmul.mubr.bf16.vlgmr.msra.gmra.mrb[0].mxu0 %v1823_v17 }
  0x7c   :  { %317 = vmatprep.mubr.bf16.mxu0 %v2107_v0 }
  0x83   :  { %318 = vmatmul.mubr.bf16.gmra.mrb[4].mxu0 %v1824_v18 }
  0x84   :  { %327 = vmatprep.mubr.bf16.mxu0 %v2107_v0 }
  0x8b   :  { %328 = vmatmul.mubr.bf16.gmra.mrb[8].mxu0 %v1825_v19 }
  0x8c   :  { %337 = vmatprep.mubr.bf16.mxu0 %v2107_v0 }
  0x93   :  { %338 = vmatmul.mubr.bf16.gmra.mrb[12].mxu0 %v1826_v20 }
  0x94   :  { %347 = vmatprep.mubr.bf16.mxu0 %v2107_v0 }
  0x9b   :  { %348 = vmatmul.mubr.bf16.gmra.mrb[16].mxu0 %v1827_v21 }
  0x9c   :  { %357 = vmatprep.mubr.bf16.mxu0 %v2107_v0 }
  0xa3   :  { %358 = vmatmul.mubr.bf16.gmra.mrb[20].mxu0 %v1828_v22 }
  0xa4   :  { %367 = vmatprep.mubr.bf16.mxu0 %v2107_v0 }
  0xab   :  { %368 = vmatmul.mubr.bf16.gmra.mrb[24].mxu0 %v1829_v23 }
  0xac   :  { %377 = vmatprep.mubr.bf16.mxu0 %v2107_v0 }
  0xb3   :  { %378 = vmatmul.mubr.bf16.gmra.mrb[28].mxu0 %v1830_v24 }
  0xb4   :  { %1740 = vmatprep.mubr.bf16.mxu0 %v2237_v25 }
 0x14e   :  { %v309_v26 = vpop.f32.mrb[0].mxu0 }
 0x14f   :  { %v2241_v27 = vpop.f32.mrb[1].mxu0 }
 0x150   :  { %v313_v28 = vpop.f32.mrb[2].mxu0 }
 0x151   :  { %v388_v29 = vpack.c.bf16 %v313_v28, %v309_v26  ;;  %v2243_v30 = vpop.f32.mrb[3].mxu0 }
 0x153   :  { %1692 = vmatprep.subr.bf16.mxu1 %v388_v29 }
 0x154   :  { %1693 = vmatpush3.bf16.msra.mxu1 %v388_v29 }
 0x156   :  { %v319_v31 = vpop.f32.mrb[4].mxu0 }
 0x157   :  { %v2245_v32 = vpop.f32.mrb[5].mxu0 }
 0x158   :  { %v323_v33 = vpop.f32.mrb[6].mxu0 }
 0x159   :  { %v389_v34 = vpack.c.bf16 %v323_v33, %v319_v31  ;;  %v2247_v35 = vpop.f32.mrb[7].mxu0 }
 0x15b   :  { %1694 = vmatprep.subr.bf16.mxu1 %v389_v34 }
 0x15c   :  { %1695 = vmatpush3.bf16.msra.mxu1 %v389_v34 }
 0x15e   :  { %v329_v36 = vpop.f32.mrb[8].mxu0 }
 0x15f   :  { %v2249_v37 = vpop.f32.mrb[9].mxu0 }
 0x160   :  { %v333_v38 = vpop.f32.mrb[10].mxu0 }
 0x161   :  { %v390_v39 = vpack.c.bf16 %v333_v38, %v329_v36  ;;  %v2251_v40 = vpop.f32.mrb[11].mxu0 }
 0x163   :  { %1696 = vmatprep.subr.bf16.mxu1 %v390_v39 }
 0x164   :  { %1697 = vmatpush3.bf16.msra.mxu1 %v390_v39 }
 0x166   :  { %v339_v41 = vpop.f32.mrb[12].mxu0 }
 0x167   :  { %v2253_v42 = vpop.f32.mrb[13].mxu0 }
 0x168   :  { %v343_v43 = vpop.f32.mrb[14].mxu0 }
 0x169   :  { %v391_v44 = vpack.c.bf16 %v343_v43, %v339_v41  ;;  %v2255_v45 = vpop.f32.mrb[15].mxu0 }
 0x16b   :  { %1698 = vmatprep.subr.bf16.mxu1 %v391_v44 }
 0x16c   :  { %1699 = vmatpush3.bf16.msra.mxu1 %v391_v44 }
 0x16e   :  { %v349_v46 = vpop.f32.mrb[16].mxu0 }
 0x16f   :  { %v2257_v47 = vpop.f32.mrb[17].mxu0 }
 0x170   :  { %v353_v48 = vpop.f32.mrb[18].mxu0 }
 0x171   :  { %v392_v49 = vpack.c.bf16 %v353_v48, %v349_v46  ;;  %v2259_v50 = vpop.f32.mrb[19].mxu0 }
 0x173   :  { %1700 = vmatprep.subr.bf16.mxu1 %v392_v49 }
 0x174   :  { %1701 = vmatpush3.bf16.msra.mxu1 %v392_v49 }
 0x176   :  { %v359_v51 = vpop.f32.mrb[20].mxu0 }
 0x177   :  { %v2261_v52 = vpop.f32.mrb[21].mxu0 }
 0x178   :  { %v363_v53 = vpop.f32.mrb[22].mxu0 }
 0x179   :  { %v393_v54 = vpack.c.bf16 %v363_v53, %v359_v51  ;;  %v2263_v55 = vpop.f32.mrb[23].mxu0 }
 0x17b   :  { %1702 = vmatprep.subr.bf16.mxu1 %v393_v54 }
 0x17c   :  { %1703 = vmatpush3.bf16.msra.mxu1 %v393_v54 }
 0x17e   :  { %v369_v56 = vpop.f32.mrb[24].mxu0 }
 0x17f   :  { %v2265_v57 = vpop.f32.mrb[25].mxu0 }
 0x180   :  { %v373_v58 = vpop.f32.mrb[26].mxu0 }
 0x181   :  { %v394_v59 = vpack.c.bf16 %v373_v58, %v369_v56  ;;  %v2267_v60 = vpop.f32.mrb[27].mxu0 }
 0x183   :  { %1704 = vmatprep.subr.bf16.mxu1 %v394_v59 }
 0x184   :  { %1705 = vmatpush3.bf16.msra.mxu1 %v394_v59 }
 0x186   :  { %v379_v61 = vpop.f32.mrb[28].mxu0 }
 0x187   :  { %v2269_v62 = vpop.f32.mrb[29].mxu0 }
 0x188   :  { %v383_v63 = vpop.f32.mrb[30].mxu0 }
 0x189   :  { %v395_v1 = vpack.c.bf16 %v383_v63, %v379_v61  ;;  %v2271_v2 = vpop.f32.mrb[31].mxu0  ;;  %v1847_v63 = vld [vmem:[#allocation8 + $0x24] ss:$8 sps:$4 sm:$0xff]  }
 0x18b   :  { %1706 = vmatprep.subr.bf16.mxu1 %v395_v1 }
 0x18c   :  { %1707 = vmatpush3.bf16.msra.mxu1 %v395_v1  ;;  %v1845_v1 = vld [vmem:[#allocation8 + $0x20] ss:$8 sps:$4 sm:$0xff]  }
 0x18d   :  { %812 = vmatprep.subr.bf16.mxu1 %v1841_v11 }
 0x18f   :  { %1709 = vmatmul.mubr.bf16.vlgmr.msra.gmra.mrb[0].mxu1 %v2273_v3 }
 0x190   :  { %1712 = vmatprep.mubr.bf16.mxu1 %v2275_v4  ;;  %813 = vmatpush1.bf16.msra.mxu1 %v1839_v10 }
 0x191   :  { %814 = vmatprep.subr.bf16.mxu1 %v1844_v12 }
 0x194   :  { %815 = vmatpush1.bf16.msra.mxu1 %v1842_v13  ;;  %v1850_v13 = vld [vmem:[#allocation8 + $0x34] ss:$8 sps:$4 sm:$0xff]  }
 0x195   :  { %816 = vmatprep.subr.bf16.mxu1 %v1847_v63 }
 0x197   :  { %1713 = vmatmul.mubr.bf16.gmra.mrb[4].mxu1 %v2279_v5 }
 0x198   :  { %1716 = vmatprep.mubr.bf16.mxu1 %v2281_v6  ;;  %817 = vmatpush1.bf16.msra.mxu1 %v1845_v1 }
 0x199   :  { %818 = vmatprep.subr.bf16.mxu1 %v1850_v13 }
 0x19f   :  { %1717 = vmatmul.mubr.bf16.gmra.mrb[8].mxu1 %v2285_v7 }
 0x1a0   :  { %1720 = vmatprep.mubr.bf16.mxu1 %v2287_v8 }
 0x1a7   :  { %1721 = vmatmul.mubr.bf16.gmra.mrb[12].mxu1 %v2291_v9 }
 0x1a8   :  { %844 = vmatprep.mubr.bf16.mxu1 %v2107_v0 }
 0x262   :  { %v1710_v14 = vpop.f32.mrb[0].mxu1 }
 0x263   :  { %v487_v16 = vadd.f32 %v1710_v14, %v2245_v32  ;;  %v478_v17 = vpop.f32.mrb[1].mxu1 }
 0x264   :  { %v479_v18 = vadd.f32 %v478_v17, %v2241_v27  ;;  %v1711_v19 = vpop.f32.mrb[2].mxu1  ;;  %v1848_v17 = vld [vmem:[#allocation8 + $0x30] ss:$8 sps:$4 sm:$0xff]  }
 0x265   :  { %v490_v20 = vadd.f32 %v1711_v19, %v2247_v35  ;;  %v481_v21 = vpop.f32.mrb[3].mxu1  ;;  %v2304_v22 = vadd.f32 %v2298_v15, %v487_v16  ;;  %819 = vmatpush1.bf16.msra.mxu1 %v1848_v17 }
 0x266   :  { %v482_v23 = vadd.f32 %v481_v21, %v2243_v30  ;;  %v2308_v24 = vadd.f32 %v2298_v15, %v479_v18 }
 0x267   :  { %v2311_v26 = vadd.f32 %v2298_v15, %v490_v20  ;;  %v566_v28 = vmul.f32 %v2304_v22, %v2304_v22 }
 0x268   :  { %v2316_v27 = vadd.f32 %v2298_v15, %v482_v23  ;;  %v564_v29 = vmul.f32 %v2308_v24, %v2308_v24 }
 0x269   :  { %584 = vadd.xlane.f32.xlu1 %v566_v28  ;;  %v567_v33 = vmul.f32 %v2311_v26, %v2311_v26 }
 0x26a   :  { %v1714_v31 = vpop.f32.mrb[4].mxu1  ;;  %580 = vadd.xlane.f32.xlu0 %v564_v29  ;;  %v565_v36 = vmul.f32 %v2316_v27, %v2316_v27 }
 0x26b   :  { %v503_v30 = vadd.f32 %v1714_v31, %v2253_v42  ;;  %v494_v32 = vpop.f32.mrb[5].mxu1  ;;  %v1851_v31 = vld [vmem:[#allocation8 + $0x40] ss:$8 sps:$4 sm:$0xff]  }
 0x26c   :  { %v495_v34 = vadd.f32 %v494_v32, %v2249_v37  ;;  %v1715_v35 = vpop.f32.mrb[6].mxu1 }
 0x26d   :  { %v506_v38 = vadd.f32 %v1715_v35, %v2255_v45  ;;  %586 = vadd.xlane.f32.xlu1 %v567_v33  ;;  %v497_v39 = vpop.f32.mrb[7].mxu1  ;;  %v2332_v42 = vadd.f32 %v2298_v15, %v503_v30  ;;  %v1854_v35 = vld [vmem:[#allocation8 + $0x50] ss:$8 sps:$4 sm:$0xff]  }
 0x26e   :  { %v2328_v41 = vadd.f32 %v2298_v15, %v495_v34  ;;  %v498_v43 = vadd.f32 %v497_v39, %v2251_v40  ;;  %582 = vadd.xlane.f32.xlu0 %v565_v36  ;;  %v1856_v34 = vld [vmem:[#allocation8 + $0x54] ss:$8 sps:$4 sm:$0xff]   ;;  %v1859_v39 = vld [vmem:[#allocation8 + $0x64] ss:$8 sps:$4 sm:$0xff]  }
 0x26f   :  { %v2340_v46 = vadd.f32 %v2298_v15, %v506_v38  ;;  %v570_v54 = vmul.f32 %v2332_v42, %v2332_v42 }
 0x270   :  { %v2335_v44 = vadd.f32 %v2298_v15, %v498_v43  ;;  %v568_v37 = vmul.f32 %v2328_v41, %v2328_v41  ;;  %v1857_v43 = vld [vmem:[#allocation8 + $0x60] ss:$8 sps:$4 sm:$0xff]  }
 0x272   :  { %v1718_v45 = vpop.f32.mrb[8].mxu1  ;;  %588 = vadd.xlane.f32.xlu0 %v568_v37  ;;  %v569_v48 = vmul.f32 %v2335_v44, %v2335_v44  ;;  %v1860_v37 = vld [vmem:[#allocation8 + $0x70] ss:$8 sps:$4 sm:$0xff]  }
 0x273   :  { %v519_v40 = vadd.f32 %v1718_v45, %v2261_v52  ;;  %v510_v49 = vpop.f32.mrb[9].mxu1  ;;  %v571_v52 = vmul.f32 %v2340_v46, %v2340_v46 }
 0x274   :  { %v511_v51 = vadd.f32 %v510_v49, %v2257_v47  ;;  %v1719_v53 = vpop.f32.mrb[10].mxu1  ;;  %590 = vadd.xlane.f32.xlu1 %v569_v48 }
 0x275   :  { %v522_v56 = vadd.f32 %v1719_v53, %v2263_v55  ;;  %v513_v58 = vpop.f32.mrb[11].mxu1  ;;  %v2356_v47 = vadd.f32 %v2298_v15, %v519_v40 }
 0x276   :  { %v2350_v59 = vadd.f32 %v2298_v15, %v511_v51  ;;  %v514_v61 = vadd.f32 %v513_v58, %v2259_v50  ;;  %592 = vadd.xlane.f32.xlu0 %v570_v54 }
 0x277   :  { %v2364_v50 = vadd.f32 %v2298_v15, %v522_v56  ;;  %v574_v20 = vmul.f32 %v2356_v47, %v2356_v47 }
 0x278   :  { %v2359_v10 = vadd.f32 %v2298_v15, %v514_v61  ;;  %594 = vadd.xlane.f32.xlu1 %v571_v52  ;;  %v572_v55 = vmul.f32 %v2350_v59, %v2350_v59 }
 0x27a   :  { %v1722_v11 = vpop.f32.mrb[12].mxu1  ;;  %596 = vadd.xlane.f32.xlu0 %v572_v55  ;;  %v573_v12 = vmul.f32 %v2359_v10, %v2359_v10 }
 0x27b   :  { %v535_v14 = vadd.f32 %v1722_v11, %v2269_v62  ;;  %v526_v16 = vpop.f32.mrb[13].mxu1  ;;  %v575_v62 = vmul.f32 %v2364_v50, %v2364_v50 }
 0x27c   :  { %v527_v18 = vadd.f32 %v526_v16, %v2265_v57  ;;  %v1723_v19 = vpop.f32.mrb[14].mxu1  ;;  %598 = vadd.xlane.f32.xlu1 %v573_v12  ;;  %v1853_v57 = vld [vmem:[#allocation8 + $0x44] ss:$8 sps:$4 sm:$0xff]  }
 0x27d   :  { %v538_v21 = vadd.f32 %v1723_v19, %v2271_v2  ;;  %v529_v23 = vpop.f32.mrb[15].mxu1  ;;  %v2380_v30 = vadd.f32 %v2298_v15, %v535_v14  ;;  %820 = vmatprep.subr.bf16.mxu1 %v1853_v57 }
 0x27e   :  { %v2374_v28 = vadd.f32 %v2298_v15, %v527_v18  ;;  %v530_v29 = vadd.f32 %v529_v23, %v2267_v60  ;;  %600 = vadd.xlane.f32.xlu0 %v574_v20  ;;  %821 = vmatpush1.bf16.msra.mxu1 %v1851_v31 }
 0x27f   :  { %v2388_v60 = vadd.f32 %v2298_v15, %v538_v21  ;;  %v578_v36 = vmul.f32 %v2380_v30, %v2380_v30  ;;  %822 = vmatprep.subr.bf16.mxu1 %v1856_v34 }
 0x280   :  { %v2383_v32 = vadd.f32 %v2298_v15, %v530_v29  ;;  %602 = vadd.xlane.f32.xlu1 %v575_v62  ;;  %v576_v2 = vmul.f32 %v2374_v28, %v2374_v28  ;;  %v1862_v15 = vld [vmem:[#allocation8 + $0x74] ss:$8 sps:$4 sm:$0xff]  }
 0x281   :  { %v579_v38 = vmul.f32 %v2388_v60, %v2388_v60 }
 0x282   :  { %604 = vadd.xlane.f32.xlu0 %v576_v2  ;;  %v577_v33 = vmul.f32 %v2383_v32, %v2383_v32  ;;  %823 = vmatpush1.bf16.msra.mxu1 %v1854_v35 }
 0x283   :  { %824 = vmatprep.subr.bf16.mxu1 %v1859_v39 }
 0x284   :  { %606 = vadd.xlane.f32.xlu1 %v577_v33 }
 0x286   :  { %608 = vadd.xlane.f32.xlu0 %v578_v36  ;;  %825 = vmatpush1.bf16.msra.mxu1 %v1857_v43 }
 0x287   :  { %826 = vmatprep.subr.bf16.mxu1 %v1862_v15 }
 0x288   :  { %610 = vadd.xlane.f32.xlu1 %v579_v38 }
 0x28a   :  { %827 = vmatpush1.bf16.msra.mxu1 %v1860_v37 }
 0x2f6   :  { %v585_v45 = vpop.xlane.xlu1 %584 }
 0x2f7   :  { %v581_v48 = vpop.xlane.xlu0 %580  ;;  %v614_v54 = vmax.f32 %v585_v45, 1e-24 }
 0x2f8   :  { %v612_v40 = vmax.f32 %v581_v48, 1e-24 }
 0x2fa   :  { %1887 = vrsqrt.f32 %v612_v40  ;;  %v587_v49 = vpop.xlane.xlu1 %586 }
 0x2fb   :  { %v615_v51 = vmax.f32 %v587_v49, 1e-24  ;;  %v583_v53 = vpop.xlane.xlu0 %582 }
 0x2fc   :  { %v613_v56 = vmax.f32 %v583_v53, 1e-24 }
 0x2fd   :  { %1889 = vrsqrt.f32 %v615_v51 }
 0x2fe   :  { %1891 = vrsqrt.f32 %v613_v56 }
 0x2ff   :  { %1893 = vrsqrt.f32 %v614_v54  ;;  %v589_v58 = vpop.xlane.xlu0 %588 }
 0x300   :  { %v616_v1 = vmax.f32 %v589_v58, 1e-24 }
 0x301   :  { %v591_v61 = vpop.xlane.xlu1 %590 }
 0x302   :  { %v617_v52 = vmax.f32 %v591_v61, 1e-24 }
 0x303   :  { %v593_v17 = vpop.xlane.xlu0 %592 }
 0x304   :  { %v1888_v63 = vpop.eup %1887  ;;  %1895 = vrsqrt.f32 %v617_v52  ;;  %v618_v23 = vmax.f32 %v593_v17, 1e-24 }
 0x305   :  { %v644_v55 = vmul.f32 %v1888_v63, %v2308_v24  ;;  %v595_v12 = vpop.xlane.xlu1 %594  ;;  %1897 = vrsqrt.f32 %v616_v1 }
 0x306   :  { %v619_v19 = vmax.f32 %v595_v12, 1e-24 }
 0x307   :  { %v1890_v11 = vpop.eup %1889  ;;  %v676_v14 = vmul.f32 0.1, %v644_v55  ;;  %vm660_vm0 = vcmp.ge.f32.partialorder %v644_v55, 0.0 }
 0x308   :  { %v1892_v13 = vpop.eup %1891  ;;  %v647_v21 = vmul.f32 %v1890_v11, %v2311_v26  ;;  %1899 = vrsqrt.f32 %v619_v19 }
 0x309   :  { %v645_v16 = vmul.f32 %v1892_v13, %v2316_v27  ;;  %v1894_v18 = vpop.eup %1893  ;;  %v692_v29 = vsel %vm660_vm0, %v644_v55, %v676_v14  ;;  %v599_v31 = vpop.xlane.xlu1 %598  ;;  %1901 = vrsqrt.f32 %v618_v23 }
 0x30a   :  { %v646_v24 = vmul.f32 %v1894_v18, %v2304_v22  ;;  %v679_v2 = vmul.f32 0.1, %v647_v21  ;;  %vm663_vm2 = vcmp.ge.f32.partialorder %v647_v21, 0.0  ;;  %v597_v27 = vpop.xlane.xlu0 %596  ;;  %v621_v36 = vmax.f32 %v599_v31, 1e-24 }
 0x30b   :  { %v677_v20 = vmul.f32 0.1, %v645_v16  ;;  %vm661_vm1 = vcmp.ge.f32.partialorder %v645_v16, 0.0  ;;  %v620_v39 = vmax.f32 %v597_v27, 1e-24 }
 0x30c   :  { %v678_v34 = vmul.f32 0.1, %v646_v24  ;;  %vm662_vm3 = vcmp.ge.f32.partialorder %v646_v24, 0.0  ;;  %v695_v26 = vsel %vm663_vm2, %v647_v21, %v679_v2  ;;  %1903 = vrsqrt.f32 %v621_v36 }
 0x30d   :  { %v693_v62 = vsel %vm661_vm1, %v645_v16, %v677_v20  ;;  %v603_v37 = vpop.xlane.xlu1 %602  ;;  %1905 = vrsqrt.f32 %v620_v39 }
 0x30e   :  { %v708_v57 = vpack.c.bf16 %v693_v62, %v692_v29  ;;  %v1896_v33 = vpop.eup %1895  ;;  %v694_v22 = vsel %vm662_vm3, %v646_v24, %v678_v34  ;;  %v601_v40 = vpop.xlane.xlu0 %600  ;;  %v623_v53 = vmax.f32 %v603_v37, 1e-24 }
 0x30f   :  { %v1898_v35 = vpop.eup %1897  ;;  %v649_v38 = vmul.f32 %v1896_v33, %v2335_v44  ;;  %v709_v15 = vpack.c.bf16 %v695_v26, %v694_v22  ;;  %v622_v56 = vmax.f32 %v601_v40, 1e-24 }
 0x310   :  { %845 = vmatmul.mubr.bf16.vlgmr.msra.gmra.mrb[16].mxu1 %v708_v57  ;;  %v648_v43 = vmul.f32 %v1898_v35, %v2328_v41  ;;  %1907 = vrsqrt.f32 %v623_v53 }
 0x311   :  { %854 = vmatprep.mubr.bf16.mxu1 %v2107_v0  ;;  %v681_v45 = vmul.f32 0.1, %v649_v38  ;;  %vm665_vm4 = vcmp.ge.f32.partialorder %v649_v38, 0.0  ;;  %v607_v52 = vpop.xlane.xlu1 %606  ;;  %1909 = vrsqrt.f32 %v622_v56 }
 0x312   :  { %v1900_v48 = vpop.eup %1899  ;;  %v680_v49 = vmul.f32 0.1, %v648_v43  ;;  %vm664_vm5 = vcmp.ge.f32.partialorder %v648_v43, 0.0  ;;  %v605_v55 = vpop.xlane.xlu0 %604  ;;  %v625_v13 = vmax.f32 %v607_v52, 1e-24 }
 0x313   :  { %v1902_v51 = vpop.eup %1901  ;;  %v697_v44 = vsel %vm665_vm4, %v649_v38, %v681_v45  ;;  %v651_v54 = vmul.f32 %v1900_v48, %v2340_v46  ;;  %v624_v16 = vmax.f32 %v605_v55, 1e-24 }
 0x314   :  { %v696_v41 = vsel %vm664_vm5, %v648_v43, %v680_v49  ;;  %v650_v58 = vmul.f32 %v1902_v51, %v2332_v42  ;;  %1911 = vrsqrt.f32 %v625_v13 }
 0x315   :  { %v710_v61 = vpack.c.bf16 %v697_v44, %v696_v41  ;;  %v683_v63 = vmul.f32 0.1, %v651_v54  ;;  %vm667_vm6 = vcmp.ge.f32.partialorder %v651_v54, 0.0  ;;  %v611_v19 = vpop.xlane.xlu1 %610  ;;  %1913 = vrsqrt.f32 %v624_v16 }
 0x316   :  { %v1904_v1 = vpop.eup %1903  ;;  %v682_v11 = vmul.f32 0.1, %v650_v58  ;;  %vm666_vm7 = vcmp.ge.f32.partialorder %v650_v58, 0.0  ;;  %v609_v23 = vpop.xlane.xlu0 %608  ;;  %v627_v24 = vmax.f32 %v611_v19, 1e-24 }
 0x317   :  { %v1906_v12 = vpop.eup %1905  ;;  %v699_v46 = vsel %vm667_vm6, %v651_v54, %v683_v63  ;;  %v653_v14 = vmul.f32 %v1904_v1, %v2359_v10  ;;  %v626_v31 = vmax.f32 %v609_v23, 1e-24 }
 0x318   :  { %855 = vmatmul.mubr.bf16.gmra.mrb[20].mxu1 %v709_v15  ;;  %v698_v42 = vsel %vm666_vm7, %v650_v58, %v682_v11  ;;  %v652_v17 = vmul.f32 %v1906_v12, %v2350_v59  ;;  %1915 = vrsqrt.f32 %v627_v24 }
 0x319   :  { %864 = vmatprep.mubr.bf16.mxu1 %v2107_v0  ;;  %v711_v18 = vpack.c.bf16 %v699_v46, %v698_v42  ;;  %v685_v20 = vmul.f32 0.1, %v653_v14  ;;  %vm669_vm8 = vcmp.ge.f32.partialorder %v653_v14, 0.0  ;;  %1917 = vrsqrt.f32 %v626_v31 }
 0x31a   :  { %v1908_v21 = vpop.eup %1907  ;;  %v684_v29 = vmul.f32 0.1, %v652_v17  ;;  %vm668_vm9 = vcmp.ge.f32.partialorder %v652_v17, 0.0 }
 0x31b   :  { %v1910_v62 = vpop.eup %1909  ;;  %v701_v10 = vsel %vm669_vm8, %v653_v14, %v685_v20  ;;  %v655_v57 = vmul.f32 %v1908_v21, %v2364_v50 }
 0x31c   :  { %v700_v59 = vsel %vm668_vm9, %v652_v17, %v684_v29  ;;  %v654_v2 = vmul.f32 %v1910_v62, %v2356_v47 }
 0x31d   :  { %v712_v33 = vpack.c.bf16 %v701_v10, %v700_v59  ;;  %v687_v27 = vmul.f32 0.1, %v655_v57  ;;  %vm671_vm10 = vcmp.ge.f32.partialorder %v655_v57, 0.0 }
 0x31e   :  { %v1912_v34 = vpop.eup %1911  ;;  %v686_v35 = vmul.f32 0.1, %v654_v2  ;;  %vm670_vm11 = vcmp.ge.f32.partialorder %v654_v2, 0.0 }
 0x31f   :  { %v1914_v36 = vpop.eup %1913  ;;  %v703_v26 = vsel %vm671_vm10, %v655_v57, %v687_v27  ;;  %v657_v38 = vmul.f32 %v1912_v34, %v2383_v32 }
 0x320   :  { %865 = vmatmul.mubr.bf16.gmra.mrb[24].mxu1 %v710_v61  ;;  %v702_v50 = vsel %vm670_vm11, %v654_v2, %v686_v35  ;;  %v656_v39 = vmul.f32 %v1914_v36, %v2374_v28 }
 0x321   :  { %874 = vmatprep.mubr.bf16.mxu1 %v2107_v0  ;;  %v713_v22 = vpack.c.bf16 %v703_v26, %v702_v50  ;;  %v689_v47 = vmul.f32 0.1, %v657_v38  ;;  %vm673_vm12 = vcmp.ge.f32.partialorder %v657_v38, 0.0 }
 0x322   :  { %v1916_v43 = vpop.eup %1915  ;;  %v688_v15 = vmul.f32 0.1, %v656_v39  ;;  %vm672_vm13 = vcmp.ge.f32.partialorder %v656_v39, 0.0 }
 0x323   :  { %v1918_v37 = vpop.eup %1917  ;;  %v705_v45 = vsel %vm673_vm12, %v657_v38, %v689_v47  ;;  %v659_v48 = vmul.f32 %v1916_v43, %v2388_v60  ;;  %v1868_v47 = vld [vmem:[#allocation10 + $0x14] ss:$8 sps:$4 sm:$0xff]  }
 0x324   :  { %v704_v40 = vsel %vm672_vm13, %v656_v39, %v688_v15  ;;  %v658_v49 = vmul.f32 %v1918_v37, %v2380_v30  ;;  %v1863_v39 = vld [vmem:[#allocation10] ss:$8 sps:$4 sm:$0xff]  }
 0x325   :  { %v714_v32 = vpack.c.bf16 %v705_v45, %v704_v40  ;;  %v691_v51 = vmul.f32 0.1, %v659_v48  ;;  %vm675_vm14 = vcmp.ge.f32.partialorder %v659_v48, 0.0 }
 0x326   :  { %v690_v28 = vmul.f32 0.1, %v658_v49  ;;  %vm674_vm15 = vcmp.ge.f32.partialorder %v658_v49, 0.0 }
 0x327   :  { %v707_v53 = vsel %vm675_vm14, %v659_v48, %v691_v51 }
 0x328   :  { %875 = vmatmul.mubr.bf16.gmra.mrb[28].mxu1 %v711_v18  ;;  %v706_v44 = vsel %vm674_vm15, %v658_v49, %v690_v28 }
 0x329   :  { %884 = vmatprep.mubr.bf16.mxu1 %v2107_v0  ;;  %v715_v54 = vpack.c.bf16 %v707_v53, %v706_v44 }
 0x330   :  { %885 = vmatmul.mubr.bf16.gmra.mrb[32].mxu1 %v712_v33 }
 0x331   :  { %894 = vmatprep.mubr.bf16.mxu1 %v2107_v0 }
 0x338   :  { %895 = vmatmul.mubr.bf16.gmra.mrb[36].mxu1 %v713_v22  ;;  %v1865_v22 = vld [vmem:[#allocation10 + $0x4] ss:$8 sps:$4 sm:$0xff]  }
 0x339   :  { %904 = vmatprep.mubr.bf16.mxu1 %v2107_v0 }
 0x340   :  { %905 = vmatmul.mubr.bf16.gmra.mrb[40].mxu1 %v714_v32 }
 0x341   :  { %914 = vmatprep.mubr.bf16.mxu1 %v2107_v0 }
 0x348   :  { %915 = vmatmul.mubr.bf16.gmra.mrb[44].mxu1 %v715_v54 }
 0x349   :  { %1772 = vmatprep.mubr.bf16.mxu1 %v2237_v25 }
 0x3e3   :  { %v846_v56 = vpop.f32.mrb[16].mxu1 }
 0x3e4   :  { %v2420_v41 = vpop.f32.mrb[17].mxu1 }
 0x3e5   :  { %v850_v60 = vpop.f32.mrb[18].mxu1 }
 0x3e6   :  { %v925_v58 = vpack.c.bf16 %v850_v60, %v846_v56  ;;  %v2422_v30 = vpop.f32.mrb[19].mxu1 }
 0x3e8   :  { %1724 = vmatprep.subr.bf16.mxu0 %v925_v58 }
 0x3e9   :  { %1725 = vmatpush3.bf16.msra.mxu0 %v925_v58 }
 0x3eb   :  { %v856_v61 = vpop.f32.mrb[20].mxu1 }
 0x3ec   :  { %v2424_v52 = vpop.f32.mrb[21].mxu1 }
 0x3ed   :  { %v860_v63 = vpop.f32.mrb[22].mxu1 }
 0x3ee   :  { %v926_v1 = vpack.c.bf16 %v860_v63, %v856_v61  ;;  %v2426_v55 = vpop.f32.mrb[23].mxu1 }
 0x3f0   :  { %1726 = vmatprep.subr.bf16.mxu0 %v926_v1 }
 0x3f1   :  { %1727 = vmatpush3.bf16.msra.mxu0 %v926_v1 }
 0x3f3   :  { %v866_v11 = vpop.f32.mrb[24].mxu1 }
 0x3f4   :  { %v2428_v25 = vpop.f32.mrb[25].mxu1 }
 0x3f5   :  { %v870_v12 = vpop.f32.mrb[26].mxu1 }
 0x3f6   :  { %v927_v13 = vpack.c.bf16 %v870_v12, %v866_v11  ;;  %v2430_v46 = vpop.f32.mrb[27].mxu1 }
 0x3f8   :  { %1728 = vmatprep.subr.bf16.mxu0 %v927_v13 }
 0x3f9   :  { %1729 = vmatpush3.bf16.msra.mxu0 %v927_v13 }
 0x3fb   :  { %v876_v14 = vpop.f32.mrb[28].mxu1 }
 0x3fc   :  { %v2432_v16 = vpop.f32.mrb[29].mxu1 }
 0x3fd   :  { %v880_v42 = vpop.f32.mrb[30].mxu1 }
 0x3fe   :  { %v928_v17 = vpack.c.bf16 %v880_v42, %v876_v14  ;;  %v2434_v18 = vpop.f32.mrb[31].mxu1 }
 0x400   :  { %1730 = vmatprep.subr.bf16.mxu0 %v928_v17 }
 0x401   :  { %1731 = vmatpush3.bf16.msra.mxu0 %v928_v17 }
 0x403   :  { %v886_v19 = vpop.f32.mrb[32].mxu1 }
 0x404   :  { %v2436_v20 = vpop.f32.mrb[33].mxu1 }
 0x405   :  { %v890_v21 = vpop.f32.mrb[34].mxu1 }
 0x406   :  { %v929_v23 = vpack.c.bf16 %v890_v21, %v886_v19  ;;  %v2438_v29 = vpop.f32.mrb[35].mxu1 }
 0x408   :  { %1732 = vmatprep.subr.bf16.mxu0 %v929_v23 }
 0x409   :  { %1733 = vmatpush3.bf16.msra.mxu0 %v929_v23 }
 0x40b   :  { %v896_v62 = vpop.f32.mrb[36].mxu1 }
 0x40c   :  { %v2440_v24 = vpop.f32.mrb[37].mxu1 }
 0x40d   :  { %v900_v10 = vpop.f32.mrb[38].mxu1 }
 0x40e   :  { %v930_v57 = vpack.c.bf16 %v900_v10, %v896_v62  ;;  %v2442_v31 = vpop.f32.mrb[39].mxu1 }
 0x410   :  { %1734 = vmatprep.subr.bf16.mxu0 %v930_v57 }
 0x411   :  { %1735 = vmatpush3.bf16.msra.mxu0 %v930_v57 }
 0x413   :  { %v906_v59 = vpop.f32.mrb[40].mxu1 }
 0x414   :  { %v2444_v2 = vpop.f32.mrb[41].mxu1 }
 0x415   :  { %v910_v33 = vpop.f32.mrb[42].mxu1 }
 0x416   :  { %v931_v27 = vpack.c.bf16 %v910_v33, %v906_v59  ;;  %v2446_v34 = vpop.f32.mrb[43].mxu1  ;;  %v1872_v59 = vld [vmem:[#allocation10 + $0x30] ss:$8 sps:$4 sm:$0xff]  }
 0x418   :  { %1736 = vmatprep.subr.bf16.mxu0 %v931_v27 }
 0x419   :  { %1737 = vmatpush3.bf16.msra.mxu0 %v931_v27 }
 0x41b   :  { %v916_v35 = vpop.f32.mrb[44].mxu1 }
 0x41c   :  { %v2448_v36 = vpop.f32.mrb[45].mxu1 }
 0x41d   :  { %v920_v26 = vpop.f32.mrb[46].mxu1 }
 0x41e   :  { %v932_v38 = vpack.c.bf16 %v920_v26, %v916_v35  ;;  %v2450_v50 = vpop.f32.mrb[47].mxu1 }
 0x420   :  { %1738 = vmatprep.subr.bf16.mxu0 %v932_v38 }
 0x421   :  { %1739 = vmatpush3.bf16.msra.mxu0 %v932_v38 }
 0x422   :  { %1301 = vmatprep.subr.bf16.mxu0 %v1865_v22 }
 0x424   :  { %1741 = vmatmul.mubr.bf16.vlgmr.msra.gmra.mrb[32].mxu0 %v2273_v3  ;;  %v1866_v3 = vld [vmem:[#allocation10 + $0x10] ss:$8 sps:$4 sm:$0xff]  }
 0x425   :  { %1744 = vmatprep.mubr.bf16.mxu0 %v2275_v4  ;;  %1302 = vmatpush1.bf16.msra.mxu0 %v1863_v39  ;;  %v1871_v4 = vld [vmem:[#allocation10 + $0x24] ss:$8 sps:$4 sm:$0xff]  }
 0x426   :  { %1303 = vmatprep.subr.bf16.mxu0 %v1868_v47  ;;  %v1877_v47 = vld [vmem:[#allocation10 + $0x44] ss:$8 sps:$4 sm:$0xff]  }
 0x429   :  { %1304 = vmatpush1.bf16.msra.mxu0 %v1866_v3 }
 0x42a   :  { %1305 = vmatprep.subr.bf16.mxu0 %v1871_v4 }
 0x42c   :  { %1745 = vmatmul.mubr.bf16.gmra.mrb[36].mxu0 %v2279_v5  ;;  %v1869_v5 = vld [vmem:[#allocation10 + $0x20] ss:$8 sps:$4 sm:$0xff]  }
 0x42d   :  { %1748 = vmatprep.mubr.bf16.mxu0 %v2281_v6  ;;  %1306 = vmatpush1.bf16.msra.mxu0 %v1869_v5  ;;  %v1875_v5 = vld [vmem:[#allocation10 + $0x40] ss:$8 sps:$4 sm:$0xff]  }
 0x434   :  { %1749 = vmatmul.mubr.bf16.gmra.mrb[40].mxu0 %v2285_v7 }
 0x435   :  { %1752 = vmatprep.mubr.bf16.mxu0 %v2287_v8  ;;  %v2464_v8 = vld [vmem:[%s2673_s5] ss:$0 sm:$0xff] }
 0x43c   :  { %1753 = vmatmul.mubr.bf16.gmra.mrb[44].mxu0 %v2291_v9 }
 0x43d   :  { %1333 = vmatprep.mubr.bf16.mxu0 %v2107_v0 }
 0x4f7   :  { %v1742_v6 = vpop.f32.mrb[32].mxu0 }
 0x4f8   :  { %v976_v7 = vadd.f32 %v1742_v6, %v2424_v52  ;;  %v967_v9 = vpop.f32.mrb[33].mxu0 }
 0x4f9   :  { %v968_v43 = vadd.f32 %v967_v9, %v2420_v41  ;;  %v1743_v15 = vpop.f32.mrb[34].mxu0 }
 0x4fa   :  { %v979_v37 = vadd.f32 %v1743_v15, %v2426_v55  ;;  %v970_v45 = vpop.f32.mrb[35].mxu0  ;;  %v2473_v49 = vadd.f32 %v2464_v8, %v976_v7  ;;  %v1878_v15 = vld [vmem:[#allocation10 + $0x50] ss:$8 sps:$4 sm:$0xff]  }
 0x4fb   :  { %v2469_v48 = vadd.f32 %v2464_v8, %v968_v43  ;;  %v971_v40 = vadd.f32 %v970_v45, %v2422_v30  ;;  %v1880_v43 = vld [vmem:[#allocation10 + $0x54] ss:$8 sps:$4 sm:$0xff]  }
 0x4fc   :  { %v2481_v28 = vadd.f32 %v2464_v8, %v979_v37  ;;  %v1055_v58 = vmul.f32 %v2473_v49, %v2473_v49 }
 0x4fd   :  { %v2476_v32 = vadd.f32 %v2464_v8, %v971_v40  ;;  %v1053_v51 = vmul.f32 %v2469_v48, %v2469_v48  ;;  %v1883_v40 = vld [vmem:[#allocation10 + $0x64] ss:$8 sps:$4 sm:$0xff]  }
 0x4fe   :  { %v1056_v1 = vmul.f32 %v2481_v28, %v2481_v28 }
 0x4ff   :  { %v1746_v53 = vpop.f32.mrb[36].mxu0  ;;  %1069 = vadd.xlane.f32.xlu0 %v1053_v51  ;;  %v1054_v44 = vmul.f32 %v2476_v32, %v2476_v32  ;;  %v1881_v51 = vld [vmem:[#allocation10 + $0x60] ss:$8 sps:$4 sm:$0xff]  }
 0x500   :  { %v992_v54 = vadd.f32 %v1746_v53, %v2432_v16  ;;  %v983_v56 = vpop.f32.mrb[37].mxu0 }
 0x501   :  { %v984_v41 = vadd.f32 %v983_v56, %v2428_v25  ;;  %v1747_v60 = vpop.f32.mrb[38].mxu0  ;;  %1071 = vadd.xlane.f32.xlu1 %v1054_v44  ;;  %v1884_v44 = vld [vmem:[#allocation10 + $0x70] ss:$8 sps:$4 sm:$0xff]  }
 0x502   :  { %v995_v30 = vadd.f32 %v1747_v60, %v2434_v18  ;;  %v986_v61 = vpop.f32.mrb[39].mxu0  ;;  %v2497_v55 = vadd.f32 %v2464_v8, %v992_v54 }
 0x503   :  { %v2491_v52 = vadd.f32 %v2464_v8, %v984_v41  ;;  %v987_v63 = vadd.f32 %v986_v61, %v2430_v46  ;;  %1073 = vadd.xlane.f32.xlu0 %v1055_v58 }
 0x504   :  { %v2505_v12 = vadd.f32 %v2464_v8, %v995_v30  ;;  %v1059_v18 = vmul.f32 %v2497_v55, %v2497_v55 }
 0x505   :  { %v2500_v11 = vadd.f32 %v2464_v8, %v987_v63  ;;  %1075 = vadd.xlane.f32.xlu1 %v1056_v1  ;;  %v1057_v25 = vmul.f32 %v2491_v52, %v2491_v52 }
 0x507   :  { %v1750_v13 = vpop.f32.mrb[40].mxu0  ;;  %1077 = vadd.xlane.f32.xlu0 %v1057_v25  ;;  %v1058_v46 = vmul.f32 %v2500_v11, %v2500_v11 }
 0x508   :  { %v1008_v14 = vadd.f32 %v1750_v13, %v2440_v24  ;;  %v999_v16 = vpop.f32.mrb[41].mxu0  ;;  %v1060_v24 = vmul.f32 %v2505_v12, %v2505_v12 }
 0x509   :  { %v1000_v42 = vadd.f32 %v999_v16, %v2436_v20  ;;  %v1751_v17 = vpop.f32.mrb[42].mxu0  ;;  %1079 = vadd.xlane.f32.xlu1 %v1058_v46 }
 0x50a   :  { %v1011_v19 = vadd.f32 %v1751_v17, %v2442_v31  ;;  %v1002_v21 = vpop.f32.mrb[43].mxu0  ;;  %v2521_v10 = vadd.f32 %v2464_v8, %v1008_v14  ;;  %v1874_v31 = vld [vmem:[#allocation10 + $0x34] ss:$8 sps:$4 sm:$0xff]  }
 0x50b   :  { %v2515_v23 = vadd.f32 %v2464_v8, %v1000_v42  ;;  %v1003_v62 = vadd.f32 %v1002_v21, %v2438_v29  ;;  %1081 = vadd.xlane.f32.xlu0 %v1059_v18  ;;  %1307 = vmatprep.subr.bf16.mxu0 %v1874_v31 }
 0x50c   :  { %v2529_v33 = vadd.f32 %v2464_v8, %v1011_v19  ;;  %1308 = vmatpush1.bf16.msra.mxu0 %v1872_v59  ;;  %v1063_v22 = vmul.f32 %v2521_v10, %v2521_v10 }
 0x50d   :  { %v2524_v20 = vadd.f32 %v2464_v8, %v1003_v62  ;;  %1083 = vadd.xlane.f32.xlu1 %v1060_v24  ;;  %v1061_v57 = vmul.f32 %v2515_v23, %v2515_v23  ;;  %1309 = vmatprep.subr.bf16.mxu0 %v1877_v47 }
 0x50f   :  { %v1754_v29 = vpop.f32.mrb[44].mxu0  ;;  %1085 = vadd.xlane.f32.xlu0 %v1061_v57  ;;  %v1062_v27 = vmul.f32 %v2524_v20, %v2524_v20 }
 0x510   :  { %v1024_v35 = vadd.f32 %v1754_v29, %v2448_v36  ;;  %v1015_v26 = vpop.f32.mrb[45].mxu0  ;;  %v1064_v36 = vmul.f32 %v2529_v33, %v2529_v33  ;;  %1310 = vmatpush1.bf16.msra.mxu0 %v1875_v5 }
 0x511   :  { %v1016_v38 = vadd.f32 %v1015_v26, %v2444_v2  ;;  %v1755_v39 = vpop.f32.mrb[46].mxu0  ;;  %1087 = vadd.xlane.f32.xlu1 %v1062_v27  ;;  %1311 = vmatprep.subr.bf16.mxu0 %v1880_v43 }
 0x512   :  { %v1027_v3 = vadd.f32 %v1755_v39, %v2450_v50  ;;  %v1018_v4 = vpop.f32.mrb[47].mxu0  ;;  %v2545_v2 = vadd.f32 %v2464_v8, %v1024_v35 }
 0x513   :  { %v2539_v6 = vadd.f32 %v2464_v8, %v1016_v38  ;;  %v1019_v7 = vadd.f32 %v1018_v4, %v2446_v34  ;;  %1089 = vadd.xlane.f32.xlu0 %v1063_v22 }
 0x514   :  { %v2553_v34 = vadd.f32 %v2464_v8, %v1027_v3  ;;  %1312 = vmatpush1.bf16.msra.mxu0 %v1878_v15  ;;  %v1067_v45 = vmul.f32 %v2545_v2, %v2545_v2 }
 0x515   :  { %v2548_v9 = vadd.f32 %v2464_v8, %v1019_v7  ;;  %1091 = vadd.xlane.f32.xlu1 %v1064_v36  ;;  %v1065_v50 = vmul.f32 %v2539_v6, %v2539_v6  ;;  %1313 = vmatprep.subr.bf16.mxu0 %v1883_v40  ;;  %v1886_v8 = vld [vmem:[#allocation10 + $0x74] ss:$8 sps:$4 sm:$0xff]  }
 0x516   :  { %v1068_v53 = vmul.f32 %v2553_v34, %v2553_v34 }
 0x517   :  { %1093 = vadd.xlane.f32.xlu0 %v1065_v50  ;;  %v1066_v37 = vmul.f32 %v2548_v9, %v2548_v9 }
 0x518   :  { %1314 = vmatpush1.bf16.msra.mxu0 %v1881_v51 }
 0x519   :  { %1095 = vadd.xlane.f32.xlu1 %v1066_v37  ;;  %1315 = vmatprep.subr.bf16.mxu0 %v1886_v8 }
 0x51b   :  { %1097 = vadd.xlane.f32.xlu0 %v1067_v45 }
 0x51c   :  { %1316 = vmatpush1.bf16.msra.mxu0 %v1884_v44 }
 0x51d   :  { %1099 = vadd.xlane.f32.xlu1 %v1068_v53 }
 0x58c   :  { %v1070_v54 = vpop.xlane.xlu0 %1069 }
 0x58d   :  { %v1101_v56 = vmax.f32 %v1070_v54, 1e-24 }
 0x58e   :  { %v1072_v41 = vpop.xlane.xlu1 %1071 }
 0x58f   :  { %1919 = vrsqrt.f32 %v1101_v56  ;;  %v1102_v60 = vmax.f32 %v1072_v41, 1e-24 }
 0x590   :  { %v1074_v58 = vpop.xlane.xlu0 %1073 }
 0x591   :  { %1921 = vrsqrt.f32 %v1102_v60  ;;  %v1103_v30 = vmax.f32 %v1074_v58, 1e-24 }
 0x592   :  { %v1076_v61 = vpop.xlane.xlu1 %1075 }
 0x593   :  { %1923 = vrsqrt.f32 %v1103_v30  ;;  %v1104_v63 = vmax.f32 %v1076_v61, 1e-24 }
 0x594   :  { %v1078_v1 = vpop.xlane.xlu0 %1077 }
 0x595   :  { %1925 = vrsqrt.f32 %v1104_v63  ;;  %v1105_v13 = vmax.f32 %v1078_v1, 1e-24 }
 0x596   :  { %v1080_v25 = vpop.xlane.xlu1 %1079 }
 0x597   :  { %v1106_v46 = vmax.f32 %v1080_v25, 1e-24 }
 0x598   :  { %v1082_v21 = vpop.xlane.xlu0 %1081 }
 0x599   :  { %v1920_v14 = vpop.eup %1919  ;;  %1927 = vrsqrt.f32 %v1106_v46  ;;  %v1107_v59 = vmax.f32 %v1082_v21, 1e-24 }
 0x59a   :  { %v1133_v16 = vmul.f32 %v1920_v14, %v2469_v48  ;;  %v1084_v42 = vpop.xlane.xlu1 %1083  ;;  %1929 = vrsqrt.f32 %v1105_v13 }
 0x59b   :  { %v1922_v17 = vpop.eup %1921  ;;  %v1108_v24 = vmax.f32 %v1084_v42, 1e-24 }
 0x59c   :  { %v1165_v18 = vmul.f32 0.1, %v1133_v16  ;;  %v1134_v19 = vmul.f32 %v1922_v17, %v2476_v32  ;;  %vm1149_vm0 = vcmp.ge.f32.partialorder %v1133_v16, 0.0  ;;  %v1086_v32 = vpop.xlane.xlu0 %1085 }
 0x59d   :  { %v1924_v62 = vpop.eup %1923  ;;  %1931 = vrsqrt.f32 %v1108_v24  ;;  %v1109_v7 = vmax.f32 %v1086_v32, 1e-24 }
 0x59e   :  { %v1166_v57 = vmul.f32 0.1, %v1134_v19  ;;  %vm1150_vm1 = vcmp.ge.f32.partialorder %v1134_v19, 0.0  ;;  %v1181_v29 = vsel %vm1149_vm0, %v1133_v16, %v1165_v18  ;;  %v1135_v35 = vmul.f32 %v1924_v62, %v2473_v49  ;;  %v1088_v38 = vpop.xlane.xlu1 %1087 }
 0x59f   :  { %v1926_v31 = vpop.eup %1925  ;;  %1933 = vrsqrt.f32 %v1107_v59  ;;  %v1110_v4 = vmax.f32 %v1088_v38, 1e-24 }
 0x5a0   :  { %v1182_v27 = vsel %vm1150_vm1, %v1134_v19, %v1166_v57  ;;  %v1136_v48 = vmul.f32 %v1926_v31, %v2481_v28  ;;  %v1167_v47 = vmul.f32 0.1, %v1135_v35  ;;  %vm1151_vm3 = vcmp.ge.f32.partialorder %v1135_v35, 0.0  ;;  %v1090_v45 = vpop.xlane.xlu0 %1089 }
 0x5a1   :  { %v1197_v26 = vpack.c.bf16 %v1182_v27, %v1181_v29  ;;  %1935 = vrsqrt.f32 %v1110_v4  ;;  %v1111_v44 = vmax.f32 %v1090_v45, 1e-24 }
 0x5a2   :  { %v1168_v39 = vmul.f32 0.1, %v1136_v48  ;;  %vm1152_vm2 = vcmp.ge.f32.partialorder %v1136_v48, 0.0  ;;  %v1183_v28 = vsel %vm1151_vm3, %v1135_v35, %v1167_v47  ;;  %v1092_v43 = vpop.xlane.xlu1 %1091  ;;  %1937 = vrsqrt.f32 %v1109_v7 }
 0x5a3   :  { %v1928_v22 = vpop.eup %1927  ;;  %1334 = vmatmul.mubr.bf16.vlgmr.msra.gmra.mrb[48].mxu0 %v1197_v26  ;;  %v1112_v53 = vmax.f32 %v1092_v43, 1e-24 }
 0x5a4   :  { %1343 = vmatprep.mubr.bf16.mxu0 %v2107_v0  ;;  %v1930_v3 = vpop.eup %1929  ;;  %v1184_v5 = vsel %vm1152_vm2, %v1136_v48, %v1168_v39  ;;  %v1138_v49 = vmul.f32 %v1928_v22, %v2500_v11  ;;  %v1094_v30 = vpop.xlane.xlu0 %1093 }
 0x5a5   :  { %v1137_v36 = vmul.f32 %v1930_v3, %v2491_v52  ;;  %v1198_v50 = vpack.c.bf16 %v1184_v5, %v1183_v28  ;;  %1939 = vrsqrt.f32 %v1112_v53  ;;  %v1113_v13 = vmax.f32 %v1094_v30, 1e-24 }
 0x5a6   :  { %v1170_v15 = vmul.f32 0.1, %v1138_v49  ;;  %vm1154_vm4 = vcmp.ge.f32.partialorder %v1138_v49, 0.0  ;;  %v1096_v41 = vpop.xlane.xlu1 %1095  ;;  %1941 = vrsqrt.f32 %v1111_v44 }
 0x5a7   :  { %v1932_v37 = vpop.eup %1931  ;;  %v1169_v40 = vmul.f32 0.1, %v1137_v36  ;;  %vm1153_vm5 = vcmp.ge.f32.partialorder %v1137_v36, 0.0  ;;  %v1114_v1 = vmax.f32 %v1096_v41, 1e-24 }
 0x5a8   :  { %v1186_v11 = vsel %vm1154_vm4, %v1138_v49, %v1170_v15  ;;  %v1140_v8 = vmul.f32 %v1932_v37, %v2505_v12  ;;  %v1098_v18 = vpop.xlane.xlu0 %1097 }
 0x5a9   :  { %v1934_v51 = vpop.eup %1933  ;;  %v1185_v52 = vsel %vm1153_vm5, %v1137_v36, %v1169_v40  ;;  %1943 = vrsqrt.f32 %v1114_v1  ;;  %v1115_v57 = vmax.f32 %v1098_v18, 1e-24 }
 0x5aa   :  { %v1139_v54 = vmul.f32 %v1934_v51, %v2497_v55  ;;  %v1199_v56 = vpack.c.bf16 %v1186_v11, %v1185_v52  ;;  %v1172_v60 = vmul.f32 0.1, %v1140_v8  ;;  %vm1156_vm6 = vcmp.ge.f32.partialorder %v1140_v8, 0.0  ;;  %v1100_v16 = vpop.xlane.xlu1 %1099 }
 0x5ab   :  { %1344 = vmatmul.mubr.bf16.gmra.mrb[52].mxu0 %v1198_v50  ;;  %v1936_v58 = vpop.eup %1935  ;;  %1945 = vrsqrt.f32 %v1113_v13  ;;  %v1116_v62 = vmax.f32 %v1100_v16, 1e-24 }
 0x5ac   :  { %1353 = vmatprep.mubr.bf16.mxu0 %v2107_v0  ;;  %v1171_v61 = vmul.f32 0.1, %v1139_v54  ;;  %v1938_v63 = vpop.eup %1937  ;;  %vm1155_vm7 = vcmp.ge.f32.partialorder %v1139_v54, 0.0  ;;  %v1188_v12 = vsel %vm1156_vm6, %v1140_v8, %v1172_v60  ;;  %v1142_v25 = vmul.f32 %v1936_v58, %v2524_v20 }
 0x5ad   :  { %v1141_v46 = vmul.f32 %v1938_v63, %v2515_v23  ;;  %1947 = vrsqrt.f32 %v1116_v62 }
 0x5ae   :  { %v1187_v55 = vsel %vm1155_vm7, %v1139_v54, %v1171_v61  ;;  %v1174_v42 = vmul.f32 0.1, %v1142_v25  ;;  %vm1158_vm8 = vcmp.ge.f32.partialorder %v1142_v25, 0.0  ;;  %1949 = vrsqrt.f32 %v1115_v57 }
 0x5af   :  { %v1200_v14 = vpack.c.bf16 %v1188_v12, %v1187_v55  ;;  %v1940_v17 = vpop.eup %1939  ;;  %v1173_v19 = vmul.f32 0.1, %v1141_v46  ;;  %vm1157_vm9 = vcmp.ge.f32.partialorder %v1141_v46, 0.0 }
 0x5b0   :  { %v1942_v21 = vpop.eup %1941  ;;  %v1190_v20 = vsel %vm1158_vm8, %v1142_v25, %v1174_v42  ;;  %v1144_v24 = vmul.f32 %v1940_v17, %v2529_v33 }
 0x5b1   :  { %v1189_v23 = vsel %vm1157_vm9, %v1141_v46, %v1173_v19  ;;  %v1143_v31 = vmul.f32 %v1942_v21, %v2521_v10 }
 0x5b2   :  { %v1201_v59 = vpack.c.bf16 %v1190_v20, %v1189_v23  ;;  %v1176_v29 = vmul.f32 0.1, %v1144_v24  ;;  %vm1160_vm10 = vcmp.ge.f32.partialorder %v1144_v24, 0.0 }
 0x5b3   :  { %1354 = vmatmul.mubr.bf16.gmra.mrb[56].mxu0 %v1199_v56  ;;  %v1944_v27 = vpop.eup %1943  ;;  %v1175_v35 = vmul.f32 0.1, %v1143_v31  ;;  %vm1159_vm11 = vcmp.ge.f32.partialorder %v1143_v31, 0.0 }
 0x5b4   :  { %1363 = vmatprep.mubr.bf16.mxu0 %v2107_v0  ;;  %v1192_v26 = vsel %vm1160_vm10, %v1144_v24, %v1176_v29  ;;  %v1146_v38 = vmul.f32 %v1944_v27, %v2548_v9  ;;  %v1952_v29 = vld [vmem:[#allocation2 + $0x10] sm:$0xff]   ;;  %v1953_v27 = vld [vmem:[#allocation2 + $0x18] sm:$0xff]  }
 0x5b5   :  { %v1946_v48 = vpop.eup %1945  ;;  %v1191_v33 = vsel %vm1159_vm11, %v1143_v31, %v1175_v35  ;;  %v1954_v35 = vld [vmem:[#allocation2 + $0x20] sm:$0xff]  }
 0x5b6   :  { %v1145_v39 = vmul.f32 %v1946_v48, %v2539_v6  ;;  %v1202_v22 = vpack.c.bf16 %v1192_v26, %v1191_v33  ;;  %v1178_v10 = vmul.f32 0.1, %v1146_v38  ;;  %vm1162_vm12 = vcmp.ge.f32.partialorder %v1146_v38, 0.0  ;;  %v1955_v48 = vld [vmem:[#allocation2 + $0x28] sm:$0xff]   ;;  %v1956_v26 = vld [vmem:[#allocation2 + $0x30] sm:$0xff]  }
 0x5b7   :  { %v1948_v32 = vpop.eup %1947 }
 0x5b8   :  { %v1177_v47 = vmul.f32 0.1, %v1145_v39  ;;  %v1950_v3 = vpop.eup %1949  ;;  %vm1161_vm13 = vcmp.ge.f32.partialorder %v1145_v39, 0.0  ;;  %v1194_v4 = vsel %vm1162_vm12, %v1146_v38, %v1178_v10  ;;  %v1148_v5 = vmul.f32 %v1948_v32, %v2553_v34  ;;  %v1957_v38 = vld [vmem:[#allocation2 + $0x38] sm:$0xff]  }
 0x5b9   :  { %v1147_v7 = vmul.f32 %v1950_v3, %v2545_v2 }
 0x5ba   :  { %v1193_v49 = vsel %vm1161_vm13, %v1145_v39, %v1177_v47  ;;  %v1180_v28 = vmul.f32 0.1, %v1148_v5  ;;  %vm1164_vm14 = vcmp.ge.f32.partialorder %v1148_v5, 0.0  ;;  %v2619_v39 = vld [vmem:[%s2675_s7] ss:$0 sm:$0xff]  ;;  %s2108_s7 = smov [#allocation11]  }
 0x5bb   :  { %1364 = vmatmul.mubr.bf16.gmra.mrb[60].mxu0 %v1200_v14  ;;  %v1203_v9 = vpack.c.bf16 %v1194_v4, %v1193_v49  ;;  %v1179_v6 = vmul.f32 0.1, %v1147_v7  ;;  %vm1163_vm15 = vcmp.ge.f32.partialorder %v1147_v7, 0.0  ;;  %s1563_s27 = sshll.u32 %s2108_s7, 4  ;;  %s1564_s27 = int_to_ptr.vmem [resolvable:$true] %s1563_s27 }
 0x5bc   :  { %1373 = vmatprep.mubr.bf16.mxu0 %v2107_v0  ;;  %v1196_v36 = vsel %vm1164_vm14, %v1148_v5, %v1180_v28  ;;  %s2068_s29 = scalar_lea.vmem %s1564_s27, 2048  ;;  %p2073_p13 = scmp.lt.s32.totalorder %s1564_s27, %s1564_s27 }
 0x5bd   :  { %v1195_v50 = vsel %vm1163_vm15, %v1147_v7, %v1179_v6  ;;  %p2069_p12 = scmp.ne.s32.totalorder %s1564_s27, %s2068_s29  ;;  %p2074_p0 = scmp.lt.s32.totalorder %s2068_s29, %s2068_s29 }
 0x5be   :  { %v1204_v43 = vpack.c.bf16 %v1196_v36, %v1195_v50 }
 0x5bf   :  { %p2075_p1 = por %p2074_p0, %p2073_p13 }
 0x5c1   :  { %p2076_p2 = pnand %p2075_p1, %p2069_p12 }
 0x5c3   :  { %1374 = vmatmul.mubr.bf16.gmra.mrb[64].mxu0 %v1201_v59  ;;  %v1951_v59 = vld [vmem:[#allocation2 + $0x8] sm:$0xff]  }
 0x5c4   :  { %1383 = vmatprep.mubr.bf16.mxu0 %v2107_v0 }
 0x5cb   :  { %1384 = vmatmul.mubr.bf16.gmra.mrb[68].mxu0 %v1202_v22 }
 0x5cc   :  { %1393 = vmatprep.mubr.bf16.mxu0 %v2107_v0 }
 0x5d3   :  { %1394 = vmatmul.mubr.bf16.gmra.mrb[72].mxu0 %v1203_v9 }
 0x5d4   :  { %1403 = vmatprep.mubr.bf16.mxu0 %v2107_v0 }
 0x5db   :  { %1404 = vmatmul.mubr.bf16.gmra.mrb[76].mxu0 %v1204_v43 }
 0x676   :  { %v1335_v15 = vpop.f32.mrb[48].mxu0 }
 0x677   :  { %v2584_v37 = vpop.f32.mrb[49].mxu0 }
 0x678   :  { %v1339_v45 = vpop.f32.mrb[50].mxu0 }
 0x679   :  { %v1414_v34 = vpack.c.bf16 %v1339_v45, %v1335_v15  ;;  %v2586_v40 = vpop.f32.mrb[51].mxu0 }
 0x67b   :  { %1756 = vmatprep.subr.bf16.mxu1 %v1414_v34 }
 0x67c   :  { %1757 = vmatpush3.bf16.msra.mxu1 %v1414_v34 }
 0x67e   :  { %v1345_v2 = vpop.f32.mrb[52].mxu0 }
 0x67f   :  { %v2588_v51 = vpop.f32.mrb[53].mxu0 }
 0x680   :  { %v1349_v53 = vpop.f32.mrb[54].mxu0 }
 0x681   :  { %v1415_v0 = vpack.c.bf16 %v1349_v53, %v1345_v2  ;;  %v2590_v11 = vpop.f32.mrb[55].mxu0 }
 0x683   :  { %1758 = vmatprep.subr.bf16.mxu1 %v1415_v0 }
 0x684   :  { %1759 = vmatpush3.bf16.msra.mxu1 %v1415_v0 }
 0x686   :  { %v1355_v8 = vpop.f32.mrb[56].mxu0 }
 0x687   :  { %v2592_v44 = vpop.f32.mrb[57].mxu0 }
 0x688   :  { %v1359_v52 = vpop.f32.mrb[58].mxu0 }
 0x689   :  { %v1416_v54 = vpack.c.bf16 %v1359_v52, %v1355_v8  ;;  %v2594_v56 = vpop.f32.mrb[59].mxu0 }
 0x68b   :  { %1760 = vmatprep.subr.bf16.mxu1 %v1416_v54 }
 0x68c   :  { %1761 = vmatpush3.bf16.msra.mxu1 %v1416_v54 }
 0x68e   :  { %v1365_v41 = vpop.f32.mrb[60].mxu0 }
 0x68f   :  { %v2596_v60 = vpop.f32.mrb[61].mxu0 }
 0x690   :  { %v1369_v58 = vpop.f32.mrb[62].mxu0 }
 0x691   :  { %v1417_v30 = vpack.c.bf16 %v1369_v58, %v1365_v41  ;;  %v2598_v61 = vpop.f32.mrb[63].mxu0 }
 0x693   :  { %1762 = vmatprep.subr.bf16.mxu1 %v1417_v30 }
 0x694   :  { %1763 = vmatpush3.bf16.msra.mxu1 %v1417_v30 }
 0x696   :  { %v1375_v63 = vpop.f32.mrb[64].mxu0 }
 0x697   :  { %v2600_v1 = vpop.f32.mrb[65].mxu0 }
 0x698   :  { %v1379_v12 = vpop.f32.mrb[66].mxu0 }
 0x699   :  { %v1418_v25 = vpack.c.bf16 %v1379_v12, %v1375_v63  ;;  %v2602_v13 = vpop.f32.mrb[67].mxu0 }
 0x69b   :  { %1764 = vmatprep.subr.bf16.mxu1 %v1418_v25 }
 0x69c   :  { %1765 = vmatpush3.bf16.msra.mxu1 %v1418_v25 }
 0x69e   :  { %v1385_v55 = vpop.f32.mrb[68].mxu0 }
 0x69f   :  { %v2604_v46 = vpop.f32.mrb[69].mxu0 }
 0x6a0   :  { %v1389_v14 = vpop.f32.mrb[70].mxu0 }
 0x6a1   :  { %v1419_v16 = vpack.c.bf16 %v1389_v14, %v1385_v55  ;;  %v2606_v42 = vpop.f32.mrb[71].mxu0 }
 0x6a3   :  { %1766 = vmatprep.subr.bf16.mxu1 %v1419_v16 }
 0x6a4   :  { %1767 = vmatpush3.bf16.msra.mxu1 %v1419_v16 }
 0x6a6   :  { %v1395_v17 = vpop.f32.mrb[72].mxu0 }
 0x6a7   :  { %v2608_v18 = vpop.f32.mrb[73].mxu0 }
 0x6a8   :  { %v1399_v19 = vpop.f32.mrb[74].mxu0 }
 0x6a9   :  { %v1420_v21 = vpack.c.bf16 %v1399_v19, %v1395_v17  ;;  %v2610_v62 = vpop.f32.mrb[75].mxu0 }
 0x6ab   :  { %1768 = vmatprep.subr.bf16.mxu1 %v1420_v21 }
 0x6ac   :  { %1769 = vmatpush3.bf16.msra.mxu1 %v1420_v21 }
 0x6ae   :  { %v1405_v20 = vpop.f32.mrb[76].mxu0 }
 0x6af   :  { %v2612_v24 = vpop.f32.mrb[77].mxu0 }
 0x6b0   :  { %v1409_v57 = vpop.f32.mrb[78].mxu0 }
 0x6b1   :  { %v1421_v23 = vpack.c.bf16 %v1409_v57, %v1405_v20  ;;  %v2614_v31 = vpop.f32.mrb[79].mxu0 }
 0x6b3   :  { %1770 = vmatprep.subr.bf16.mxu1 %v1421_v23 }
 0x6b4   :  { %1771 = vmatpush3.bf16.msra.mxu1 %v1421_v23 }
 0x6b7   :  { %1773 = vmatmul.mubr.bf16.vlgmr.msra.gmra.mrb[48].mxu1 %v1951_v59 }
 0x6b8   :  { %1776 = vmatprep.mubr.bf16.mxu1 %v1952_v29 }
 0x6bf   :  { %1777 = vmatmul.mubr.bf16.gmra.mrb[52].mxu1 %v1953_v27 }
 0x6c0   :  { %1780 = vmatprep.mubr.bf16.mxu1 %v1954_v35 }
 0x6c7   :  { %1781 = vmatmul.mubr.bf16.gmra.mrb[56].mxu1 %v1955_v48 }
 0x6c8   :  { %1784 = vmatprep.mubr.bf16.mxu1 %v1956_v26 }
 0x6cf   :  { %1785 = vmatmul.mubr.bf16.gmra.mrb[60].mxu1 %v1957_v38 }
 0x78a   :  { %v1774_v33 = vpop.f32.mrb[48].mxu1 }
 0x78b   :  { %v1465_v22 = vadd.f32 %v1774_v33, %v2588_v51  ;;  %v1456_v10 = vpop.f32.mrb[49].mxu1 }
 0x78c   :  { %v1457_v32 = vadd.f32 %v1456_v10, %v2584_v37  ;;  %v1775_v47 = vpop.f32.mrb[50].mxu1 }
 0x78d   :  { %v1528_v3 = vadd.f32 %v2619_v39, %v1465_v22  ;;  %v1468_v4 = vadd.f32 %v1775_v47, %v2590_v11  ;;  %v1459_v5 = vpop.f32.mrb[51].mxu1 }
 0x78e   :  { %v1526_v49 = vadd.f32 %v2619_v39, %v1457_v32  ;;  %v1460_v7 = vadd.f32 %v1459_v5, %v2586_v40 }
 0x78f   :  { %1544 = vst [vmem:[#allocation11 + $0x10] sm:$0xff] %v1528_v3  ;;  %v1529_v9 = vadd.f32 %v2619_v39, %v1468_v4 }
 0x790   :  { %1542 = vst [vmem:[#allocation11] sm:$0xff] %v1526_v49  ;;  %v1527_v28 = vadd.f32 %v2619_v39, %v1460_v7 }
 0x791   :  { %1545 = vst [vmem:[#allocation11 + $0x18] sm:$0xff] %v1529_v9 }
 0x792   :  { %1543 = vst [vmem:[#allocation11 + $0x8] sm:$0xff] %v1527_v28  ;;  %v1778_v6 = vpop.f32.mrb[52].mxu1 }
 0x793   :  { %v1481_v36 = vadd.f32 %v1778_v6, %v2596_v60  ;;  %v1472_v50 = vpop.f32.mrb[53].mxu1 }
 0x794   :  { %v1473_v43 = vadd.f32 %v1472_v50, %v2592_v44  ;;  %v1779_v15 = vpop.f32.mrb[54].mxu1 }
 0x795   :  { %v1532_v37 = vadd.f32 %v2619_v39, %v1481_v36  ;;  %v1484_v45 = vadd.f32 %v1779_v15, %v2598_v61  ;;  %v1475_v34 = vpop.f32.mrb[55].mxu1 }
 0x796   :  { %v1530_v40 = vadd.f32 %v2619_v39, %v1473_v43  ;;  %v1476_v2 = vadd.f32 %v1475_v34, %v2594_v56 }
 0x797   :  { %1548 = vst [vmem:[#allocation11 + $0x30] sm:$0xff] %v1532_v37  ;;  %v1533_v51 = vadd.f32 %v2619_v39, %v1484_v45 }
 0x798   :  { %1546 = vst [vmem:[#allocation11 + $0x20] sm:$0xff] %v1530_v40  ;;  %v1531_v53 = vadd.f32 %v2619_v39, %v1476_v2 }
 0x799   :  { %1549 = vst [vmem:[#allocation11 + $0x38] sm:$0xff] %v1533_v51 }
 0x79a   :  { %1547 = vst [vmem:[#allocation11 + $0x28] sm:$0xff] %v1531_v53  ;;  %v1782_v0 = vpop.f32.mrb[56].mxu1 }
 0x79b   :  { %v1497_v11 = vadd.f32 %v1782_v0, %v2604_v46  ;;  %v1488_v8 = vpop.f32.mrb[57].mxu1 }
 0x79c   :  { %v1489_v44 = vadd.f32 %v1488_v8, %v2600_v1  ;;  %v1783_v52 = vpop.f32.mrb[58].mxu1 }
 0x79d   :  { %v1536_v54 = vadd.f32 %v2619_v39, %v1497_v11  ;;  %v1500_v41 = vadd.f32 %v1783_v52, %v2606_v42  ;;  %v1491_v56 = vpop.f32.mrb[59].mxu1 }
 0x79e   :  { %v1534_v60 = vadd.f32 %v2619_v39, %v1489_v44  ;;  %v1492_v58 = vadd.f32 %v1491_v56, %v2602_v13 }
 0x79f   :  { %1552 = vst [vmem:[#allocation11 + $0x50] sm:$0xff] %v1536_v54  ;;  %v1537_v30 = vadd.f32 %v2619_v39, %v1500_v41 }
 0x7a0   :  { %1550 = vst [vmem:[#allocation11 + $0x40] sm:$0xff] %v1534_v60  ;;  %v1535_v61 = vadd.f32 %v2619_v39, %v1492_v58 }
 0x7a1   :  { %1553 = vst [vmem:[#allocation11 + $0x58] sm:$0xff] %v1537_v30 }
 0x7a2   :  { %1551 = vst [vmem:[#allocation11 + $0x48] sm:$0xff] %v1535_v61  ;;  %v1786_v63 = vpop.f32.mrb[60].mxu1 }
 0x7a3   :  { %v1513_v1 = vadd.f32 %v1786_v63, %v2612_v24  ;;  %v1504_v12 = vpop.f32.mrb[61].mxu1 }
 0x7a4   :  { %v1505_v25 = vadd.f32 %v1504_v12, %v2608_v18  ;;  %v1787_v55 = vpop.f32.mrb[62].mxu1 }
 0x7a5   :  { %v1540_v46 = vadd.f32 %v2619_v39, %v1513_v1  ;;  %v1516_v14 = vadd.f32 %v1787_v55, %v2614_v31  ;;  %v1507_v13 = vpop.f32.mrb[63].mxu1 }
 0x7a6   :  { %v1538_v16 = vadd.f32 %v2619_v39, %v1505_v25  ;;  %v1508_v42 = vadd.f32 %v1507_v13, %v2610_v62 }
 0x7a7   :  { %1556 = vst [vmem:[#allocation11 + $0x70] sm:$0xff] %v1540_v46  ;;  %v1541_v17 = vadd.f32 %v2619_v39, %v1516_v14 }
 0x7a8   :  { %1554 = vst [vmem:[#allocation11 + $0x60] sm:$0xff] %v1538_v16  ;;  %v1539_v19 = vadd.f32 %v2619_v39, %v1508_v42 }
 0x7a9   :  { %1557 = vst [vmem:[#allocation11 + $0x78] sm:$0xff] %v1541_v17 }
 0x7aa   :  { %1555 = vst [vmem:[#allocation11 + $0x68] sm:$0xff] %v1539_v19 }
 0x7ab   :  { %2079 = shalt.err (!%p2076_p2)
}
 0x7ac   :  { %s2080_s10 = scalar_lea.hbm %s2676_s8, 2048 }
 0x7ad   :  { %p2081_p3 = scmp.ne.s32.totalorder %s2676_s8, %s2080_s10  ;;  %p2084_p4 = scmp.lt.u32.totalorder %s2080_s10, %s2676_s8 }
 0x7af   :  { %p2086_p5 = pnand %p2084_p4, %p2081_p3 }
 0x7b1   :  { %2089 = shalt.err (!%p2086_p5)
}
 0x7b2   :  { %1569 = dma.vmem_to_hbm [thread:$0]  %s1564_s27, 2048, %s2676_s8, [#allocation4], %s2103_s28, %s2103_s28, %s2104_s9  }
 0x7b3   :  { %2096 = dma.done.wait [#allocation4], 2048  }
 0x7b4   :  { %2097 = vsyncadd [#allocation4], 4294965248 }
 0x7b5   :  { %1573 = vsyncpa [#allocation3], 1 }
 0x7b6   :  { %1574 = vsyncpa [#allocation6], 1 }
 0x7b7   :  { %1575 = vsyncpa [#allocation9], 1 }
 0x7b8   :  { %1576 = vsyncpa [#allocation4], 1 }

</bundles_post_ra>
